<compile_context>
chip_gen: v7x
topology: tpu7x:2x2x1
jax: 0.10.0
libtpu: 0.0.40
codegen_flags: <defaults>
</compile_context>

<pallas_src>
import math
import functools

import jax
import jax.numpy as jnp
from jax import lax
from jax.experimental import pallas as pl
from jax.experimental.pallas import tpu as pltpu

HIDDEN = 32
NUM_HEADS = 4
HEAD_DIM = HIDDEN // NUM_HEADS
INTERMEDIATE = 64
NUM_LAYERS = 2
LN_EPS = 1e-12
ATTN_SCALE = 1.0 / math.sqrt(HEAD_DIM)


# ---------------- fused per-layer Pallas kernel ----------------

def _layer_norm(v, gamma, beta, eps):
    mu = jnp.mean(v, axis=-1, keepdims=True)
    var = jnp.mean((v - mu) ** 2, axis=-1, keepdims=True)
    return (v - mu) * lax.rsqrt(var + eps) * gamma + beta


def _bert_layer_kernel(x_ref, mask_ref, hm_ref,
                       wqkv_ref, bqkv_ref, wo_ref, bo_ref, ln1g_ref, ln1b_ref,
                       wi_ref, bi_ref, wo2_ref, bo2_ref, ln2g_ref, ln2b_ref,
                       o_ref, *, scale, eps):
    x = x_ref[...].astype(jnp.float32)          # (S, H)   one batch element
    mask = mask_ref[...].astype(jnp.float32)    # (S, S)   additive key mask per query row
    hm = hm_ref[...].astype(jnp.float32)        # (1, H)   head mask repeated over each head's lanes
    wo = wo_ref[...].astype(jnp.float32)        # (H, H)

    # ---- fused QKV projection: single MXU matmul (H x 3H) ----
    qkv = jnp.dot(x, wqkv_ref[...], preferred_element_type=jnp.float32) + bqkv_ref[...]

    # ---- multi-head self-attention, heads fully unrolled ----
    # Attention-output projection folded into the loop:
    #   ctx @ Wo == sum_h ctx_h @ Wo[h*D:(h+1)*D, :]
    attn_out = bo_ref[...].astype(jnp.float32)  # (1, H) -> broadcasts against (S, H)
    for h in range(NUM_HEADS):
        lo = h * HEAD_DIM
        qh = qkv[:, lo:lo + HEAD_DIM]                               # (S, D)
        kh = qkv[:, HIDDEN + lo:HIDDEN + lo + HEAD_DIM]             # (S, D)
        vh = qkv[:, 2 * HIDDEN + lo:2 * HIDDEN + lo + HEAD_DIM]     # (S, D)
        s = lax.dot_general(qh, kh, (((1,), (1,)), ((), ())),
                            preferred_element_type=jnp.float32) * scale
        s = s + mask
        m = jnp.max(s, axis=-1, keepdims=True)
        p = jnp.exp(s - m)
        p = p * pl.reciprocal(jnp.sum(p, axis=-1, keepdims=True), approx=True)
        ctx_h = jnp.dot(p, vh, preferred_element_type=jnp.float32)  # (S, D)
        ctx_h = ctx_h * hm[:, lo:lo + HEAD_DIM]                     # per-head mask
        attn_out = attn_out + jnp.dot(ctx_h, wo[lo:lo + HEAD_DIM, :],
                                      preferred_element_type=jnp.float32)

    h1 = _layer_norm(attn_out + x, ln1g_ref[...], ln1b_ref[...], eps)

    # ---- feed-forward ----
    inter = jnp.dot(h1, wi_ref[...], preferred_element_type=jnp.float32) + bi_ref[...]
    # TODO(synk): HF BERT uses erf-based gelu; tanh approximation ("gelu_new") used here.
    inter = 0.5 * inter * (1.0 + jnp.tanh(0.7978845608028654
                                          * (inter + 0.044715 * inter * inter * inter)))
    out = jnp.dot(inter, wo2_ref[...], preferred_element_type=jnp.float32) + bo2_ref[...]
    h2 = _layer_norm(out + h1, ln2g_ref[...], ln2b_ref[...], eps)

    o_ref[...] = h2.astype(o_ref.dtype)


def bert_layer_fused(p, hidden_states, attention_mask, head_mask_i):
    """One fused pallas_call for a full BERT layer. hidden_states: (B, S, H)."""
    B, S, H = hidden_states.shape
    x = hidden_states.reshape(B * S, H)

    if attention_mask is None:
        attention_mask = jnp.zeros((B, S), jnp.float32)
    if head_mask_i is None:
        head_mask_i = jnp.ones((NUM_HEADS,), jnp.float32)

    # Per-query additive key mask, laid out so the kernel block is a clean (S, S) tile.
    mask_rows = jnp.broadcast_to(attention_mask.astype(jnp.float32)[:, None, :],
                                 (B, S, S)).reshape(B * S, S)
    # Head mask broadcast over each head's lanes -> (1, H), applied to the context.
    hm_lanes = jnp.repeat(head_mask_i.astype(jnp.float32), HEAD_DIM).reshape(1, H)

    # Fused QKV weight / bias (3 projections -> 1 matmul inside the kernel).
    w_qkv = jnp.concatenate([p["wq"], p["wk"], p["wv"]], axis=1)                # (H, 3H)
    b_qkv = jnp.concatenate([p["bq"], p["bk"], p["bv"]], axis=0).reshape(1, 3 * H)

    kernel = functools.partial(_bert_layer_kernel, scale=ATTN_SCALE, eps=LN_EPS)
    const = lambda b: (0, 0)

    out = pl.pallas_call(
        kernel,
        out_shape=jax.ShapeDtypeStruct((B * S, H), hidden_states.dtype),
        grid=(B,),
        in_specs=[
            pl.BlockSpec((S, H), lambda b: (b, 0)),       # x rows of this batch element
            pl.BlockSpec((S, S), lambda b: (b, 0)),       # additive attention mask rows
            pl.BlockSpec((1, H), const),                  # head mask (lane-repeated)
            pl.BlockSpec((H, 3 * H), const),              # fused QKV weight
            pl.BlockSpec((1, 3 * H), const),              # fused QKV bias
            pl.BlockSpec((H, H), const),                  # attention output weight
            pl.BlockSpec((1, H), const),                  # attention output bias
            pl.BlockSpec((1, H), const),                  # LN1 gamma
            pl.BlockSpec((1, H), const),                  # LN1 beta
            pl.BlockSpec((H, INTERMEDIATE), const),       # FFN in weight
            pl.BlockSpec((1, INTERMEDIATE), const),       # FFN in bias
            pl.BlockSpec((INTERMEDIATE, H), const),       # FFN out weight
            pl.BlockSpec((1, H), const),                  # FFN out bias
            pl.BlockSpec((1, H), const),                  # LN2 gamma
            pl.BlockSpec((1, H), const),                  # LN2 beta
        ],
        out_specs=pl.BlockSpec((S, H), lambda b: (b, 0)),
        compiler_params=pltpu.CompilerParams(dimension_semantics=("parallel",)),
    )(x, mask_rows, hm_lanes, w_qkv, b_qkv,
      p["wo"], p["bo"].reshape(1, H),
      p["ln1_g"].reshape(1, H), p["ln1_b"].reshape(1, H),
      p["wi"], p["bi"].reshape(1, INTERMEDIATE),
      p["wo2"], p["bo2"].reshape(1, H),
      p["ln2_g"].reshape(1, H), p["ln2_b"].reshape(1, H))
    return out.reshape(B, S, H)


# ---------------- encoder glue (mirrors BertEncoder4SentMix.forward) ----------------

def bert_encoder_4sentmix(params, hidden_states, hidden_states2=None, l=None,
                          mix_layer=1000, attention_mask=None, attention_mask2=None,
                          head_mask=None):
    """output_hidden_states=True, output_attentions=False."""
    B, S, _ = hidden_states.shape
    all_hidden_states = ()

    if mix_layer == -1 and hidden_states2 is not None:
        hidden_states = l * hidden_states + (1 - l) * hidden_states2

    for i, layer_p in enumerate(params):
        hm_i = None if head_mask is None else head_mask[i]
        if i <= mix_layer:
            all_hidden_states = all_hidden_states + (hidden_states,)
            if hidden_states2 is not None:
                # Both sentence streams through the layer in ONE fused, batched call.
                combined = jnp.concatenate([hidden_states, hidden_states2], axis=0)
                if attention_mask is None and attention_mask2 is None:
                    mask_c = None
                else:
                    am = (attention_mask if attention_mask is not None
                          else jnp.zeros((B, S), jnp.float32))
                    am2 = (attention_mask2 if attention_mask2 is not None
                           else jnp.zeros((B, S), jnp.float32))
                    mask_c = jnp.concatenate([am, am2], axis=0)
                out_c = bert_layer_fused(layer_p, combined, mask_c, hm_i)
                hidden_states, hidden_states2 = out_c[:B], out_c[B:]
            else:
                hidden_states = bert_layer_fused(layer_p, hidden_states, attention_mask, hm_i)
        if i == mix_layer:
            if hidden_states2 is not None:
                mixed0 = l * hidden_states[:, 0, :] + (1 - l) * hidden_states2[:, 0, :]
                hidden_states = hidden_states.at[:, 0, :].set(mixed0)
        if i > mix_layer:
            all_hidden_states = all_hidden_states + (hidden_states,)
            hidden_states = bert_layer_fused(layer_p, hidden_states, attention_mask, hm_i)

    all_hidden_states = all_hidden_states + (hidden_states,)
    return (hidden_states, all_hidden_states)


# ---------------- deterministic parameter init ----------------

def init_layer_params(key):
    keys = jax.random.split(key, 6)

    def w(k, shape):
        return 0.02 * jax.random.normal(k, shape, dtype=jnp.float32)

    return {
        "wq": w(keys[0], (HIDDEN, HIDDEN)), "bq": jnp.zeros((HIDDEN,), jnp.float32),
        "wk": w(keys[1], (HIDDEN, HIDDEN)), "bk": jnp.zeros((HIDDEN,), jnp.float32),
        "wv": w(keys[2], (HIDDEN, HIDDEN)), "bv": jnp.zeros((HIDDEN,), jnp.float32),
        "wo": w(keys[3], (HIDDEN, HIDDEN)), "bo": jnp.zeros((HIDDEN,), jnp.float32),
        "ln1_g": jnp.ones((HIDDEN,), jnp.float32), "ln1_b": jnp.zeros((HIDDEN,), jnp.float32),
        "wi": w(keys[4], (HIDDEN, INTERMEDIATE)), "bi": jnp.zeros((INTERMEDIATE,), jnp.float32),
        "wo2": w(keys[5], (INTERMEDIATE, HIDDEN)), "bo2": jnp.zeros((HIDDEN,), jnp.float32),
        "ln2_g": jnp.ones((HIDDEN,), jnp.float32), "ln2_b": jnp.zeros((HIDDEN,), jnp.float32),
    }


if __name__ == "__main__":
    B, S = 2, 8
    key = jax.random.PRNGKey(0)
    k_hs, k_hs2, k_params = jax.random.split(key, 3)

    hidden_states = jax.random.normal(k_hs, (B, S, HIDDEN), dtype=jnp.float32)
    hidden_states2 = jax.random.normal(k_hs2, (B, S, HIDDEN), dtype=jnp.float32)

    params = [init_layer_params(k) for k in jax.random.split(k_params, NUM_LAYERS)]

    # HF-style extended additive attention masks: 0 = attend, -10000 = masked.
    lengths = jnp.array([S, S - 2])
    pos = jnp.arange(S)[None, :]
    attention_mask = jnp.where(pos < lengths[:, None], 0.0, -10000.0).astype(jnp.float32)
    attention_mask2 = jnp.zeros((B, S), jnp.float32)

    head_mask = jnp.ones((NUM_LAYERS, NUM_HEADS), jnp.float32)

    l_mix = 0.6
    mix_layer = 0  # mix the [CLS] token after layer 0, then run remaining layers

    encoder = jax.jit(functools.partial(bert_encoder_4sentmix, mix_layer=mix_layer))
    out, all_hidden = encoder(
        params, hidden_states, hidden_states2=hidden_states2, l=l_mix,
        attention_mask=attention_mask, attention_mask2=attention_mask2,
        head_mask=head_mask)

    jax.block_until_ready(out)
    jax.block_until_ready(all_hidden)
    assert out.shape == (B, S, HIDDEN)
    assert len(all_hidden) == NUM_LAYERS + 1
    print("KERNEL_OK")
</pallas_src>

<mosaic_0001>
module attributes {stable_mosaic.version = 11 : i64} {
  func.func @_bert_layer_kernel(%arg0: i32, %arg1: memref<8x32xf32, #tpu.memory_space<vmem>>, %arg2: memref<8x8xf32, #tpu.memory_space<vmem>>, %arg3: memref<1x32xf32, #tpu.memory_space<vmem>>, %arg4: memref<32x96xf32, #tpu.memory_space<vmem>>, %arg5: memref<1x96xf32, #tpu.memory_space<vmem>>, %arg6: memref<32x32xf32, #tpu.memory_space<vmem>>, %arg7: memref<1x32xf32, #tpu.memory_space<vmem>>, %arg8: memref<1x32xf32, #tpu.memory_space<vmem>>, %arg9: memref<1x32xf32, #tpu.memory_space<vmem>>, %arg10: memref<32x64xf32, #tpu.memory_space<vmem>>, %arg11: memref<1x64xf32, #tpu.memory_space<vmem>>, %arg12: memref<64x32xf32, #tpu.memory_space<vmem>>, %arg13: memref<1x32xf32, #tpu.memory_space<vmem>>, %arg14: memref<1x32xf32, #tpu.memory_space<vmem>>, %arg15: memref<1x32xf32, #tpu.memory_space<vmem>>, %arg16: memref<8x32xf32, #tpu.memory_space<vmem>>) attributes {dimension_semantics = [#tpu.dimension_semantics<parallel>], iteration_bounds = array<i64: 4>, scalar_prefetch = 0 : i64, scratch_operands = 0 : i64, tpu.core_type = #tpu.core_type<tc>, window_params = [{transform_indices = @transform_0, window_bounds = array<i64: 8, 32>}, {transform_indices = @transform_1, window_bounds = array<i64: 8, 8>}, {pipeline_mode = #tpu.pipeline_mode<synchronous>, transform_indices = @transform_2, window_bounds = array<i64: 1, 32>}, {pipeline_mode = #tpu.pipeline_mode<synchronous>, transform_indices = @transform_3, window_bounds = array<i64: 32, 96>}, {pipeline_mode = #tpu.pipeline_mode<synchronous>, transform_indices = @transform_4, window_bounds = array<i64: 1, 96>}, {pipeline_mode = #tpu.pipeline_mode<synchronous>, transform_indices = @transform_5, window_bounds = array<i64: 32, 32>}, {pipeline_mode = #tpu.pipeline_mode<synchronous>, transform_indices = @transform_6, window_bounds = array<i64: 1, 32>}, {pipeline_mode = #tpu.pipeline_mode<synchronous>, transform_indices = @transform_7, window_bounds = array<i64: 1, 32>}, {pipeline_mode = #tpu.pipeline_mode<synchronous>, transform_indices = @transform_8, window_bounds = array<i64: 1, 32>}, {pipeline_mode = #tpu.pipeline_mode<synchronous>, transform_indices = @transform_9, window_bounds = array<i64: 32, 64>}, {pipeline_mode = #tpu.pipeline_mode<synchronous>, transform_indices = @transform_10, window_bounds = array<i64: 1, 64>}, {pipeline_mode = #tpu.pipeline_mode<synchronous>, transform_indices = @transform_11, window_bounds = array<i64: 64, 32>}, {pipeline_mode = #tpu.pipeline_mode<synchronous>, transform_indices = @transform_12, window_bounds = array<i64: 1, 32>}, {pipeline_mode = #tpu.pipeline_mode<synchronous>, transform_indices = @transform_13, window_bounds = array<i64: 1, 32>}, {pipeline_mode = #tpu.pipeline_mode<synchronous>, transform_indices = @transform_14, window_bounds = array<i64: 1, 32>}, {transform_indices = @transform_15, window_bounds = array<i64: 8, 32>}]} {
    %c0 = arith.constant 0 : index
    %c0_0 = arith.constant 0 : index
    %0 = vector.load %arg1[%c0, %c0_0] : memref<8x32xf32, #tpu.memory_space<vmem>>, vector<8x32xf32>
    %c0_1 = arith.constant 0 : index
    %c0_2 = arith.constant 0 : index
    %1 = vector.load %arg2[%c0_1, %c0_2] : memref<8x8xf32, #tpu.memory_space<vmem>>, vector<8x8xf32>
    %c0_3 = arith.constant 0 : index
    %c0_4 = arith.constant 0 : index
    %2 = vector.load %arg3[%c0_3, %c0_4] : memref<1x32xf32, #tpu.memory_space<vmem>>, vector<1x32xf32>
    %c0_5 = arith.constant 0 : index
    %c0_6 = arith.constant 0 : index
    %3 = vector.load %arg6[%c0_5, %c0_6] : memref<32x32xf32, #tpu.memory_space<vmem>>, vector<32x32xf32>
    %c0_7 = arith.constant 0 : index
    %c0_8 = arith.constant 0 : index
    %4 = vector.load %arg4[%c0_7, %c0_8] : memref<32x96xf32, #tpu.memory_space<vmem>>, vector<32x96xf32>
    %cst = arith.constant dense<0.000000e+00> : vector<8x96xf32>
    %5 = tpu.matmul %0, %4, %cst {dimension_numbers = #tpu.dot_dimension_numbers<[1], [0], [0], [1], [0, 0, 1, 1], [], []>} : vector<8x32xf32>, vector<32x96xf32>, vector<8x96xf32> -> vector<8x96xf32>
    %c0_9 = arith.constant 0 : index
    %c0_10 = arith.constant 0 : index
    %6 = vector.load %arg5[%c0_9, %c0_10] : memref<1x96xf32, #tpu.memory_space<vmem>>, vector<1x96xf32>
    %7 = vector.broadcast %6 : vector<1x96xf32> to vector<8x96xf32>
    %8 = arith.addf %5, %7 : vector<8x96xf32>
    %c0_11 = arith.constant 0 : index
    %c0_12 = arith.constant 0 : index
    %9 = vector.load %arg7[%c0_11, %c0_12] : memref<1x32xf32, #tpu.memory_space<vmem>>, vector<1x32xf32>
    %10 = vector.extract_strided_slice %8 {offsets = [0, 0], sizes = [8, 8], strides = [1, 1]} : vector<8x96xf32> to vector<8x8xf32>
    %11 = vector.extract_strided_slice %8 {offsets = [0, 32], sizes = [8, 8], strides = [1, 1]} : vector<8x96xf32> to vector<8x8xf32>
    %12 = vector.extract_strided_slice %8 {offsets = [0, 64], sizes = [8, 8], strides = [1, 1]} : vector<8x96xf32> to vector<8x8xf32>
    %cst_13 = arith.constant dense<0.000000e+00> : vector<8x8xf32>
    %13 = tpu.matmul %10, %11, %cst_13 {dimension_numbers = #tpu.dot_dimension_numbers<[1], [1], [0], [0], [0, 0, 1, 0], [], []>} : vector<8x8xf32>, vector<8x8xf32>, vector<8x8xf32> -> vector<8x8xf32>
    %cst_14 = arith.constant 0.353553385 : f32
    %14 = vector.broadcast %cst_14 : f32 to vector<8x8xf32>
    %15 = arith.mulf %13, %14 : vector<8x8xf32>
    %16 = arith.addf %15, %1 : vector<8x8xf32>
    %cst_15 = arith.constant dense<0xFF800000> : vector<8xf32>
    %17 = vector.multi_reduction <maximumf>, %16, %cst_15 [1] : vector<8x8xf32> to vector<8xf32>
    %18 = vector.shape_cast %17 : vector<8xf32> to vector<8x1xf32>
    %19 = vector.broadcast %18 : vector<8x1xf32> to vector<8x8xf32>
    %20 = arith.subf %16, %19 : vector<8x8xf32>
    %21 = math.exp %20 : vector<8x8xf32>
    %cst_16 = arith.constant dense<0.000000e+00> : vector<8xf32>
    %22 = vector.multi_reduction <add>, %21, %cst_16 [1] : vector<8x8xf32> to vector<8xf32>
    %23 = vector.shape_cast %22 : vector<8xf32> to vector<8x1xf32>
    %24 = tpu.reciprocal %23 {approx = true} : vector<8x1xf32> -> vector<8x1xf32>
    %25 = vector.broadcast %24 : vector<8x1xf32> to vector<8x8xf32>
    %26 = arith.mulf %21, %25 : vector<8x8xf32>
    %cst_17 = arith.constant dense<0.000000e+00> : vector<8x8xf32>
    %27 = tpu.matmul %26, %12, %cst_17 {dimension_numbers = #tpu.dot_dimension_numbers<[1], [0], [0], [1], [0, 0, 1, 1], [], []>} : vector<8x8xf32>, vector<8x8xf32>, vector<8x8xf32> -> vector<8x8xf32>
    %28 = vector.extract_strided_slice %2 {offsets = [0, 0], sizes = [1, 8], strides = [1, 1]} : vector<1x32xf32> to vector<1x8xf32>
    %29 = vector.broadcast %28 : vector<1x8xf32> to vector<8x8xf32>
    %30 = arith.mulf %27, %29 : vector<8x8xf32>
    %31 = vector.extract_strided_slice %3 {offsets = [0, 0], sizes = [8, 32], strides = [1, 1]} : vector<32x32xf32> to vector<8x32xf32>
    %cst_18 = arith.constant dense<0.000000e+00> : vector<8x32xf32>
    %32 = tpu.matmul %30, %31, %cst_18 {dimension_numbers = #tpu.dot_dimension_numbers<[1], [0], [0], [1], [0, 0, 1, 1], [], []>} : vector<8x8xf32>, vector<8x32xf32>, vector<8x32xf32> -> vector<8x32xf32>
    %33 = vector.broadcast %9 : vector<1x32xf32> to vector<8x32xf32>
    %34 = arith.addf %33, %32 : vector<8x32xf32>
    %35 = vector.extract_strided_slice %8 {offsets = [0, 8], sizes = [8, 8], strides = [1, 1]} : vector<8x96xf32> to vector<8x8xf32>
    %36 = vector.extract_strided_slice %8 {offsets = [0, 40], sizes = [8, 8], strides = [1, 1]} : vector<8x96xf32> to vector<8x8xf32>
    %37 = vector.extract_strided_slice %8 {offsets = [0, 72], sizes = [8, 8], strides = [1, 1]} : vector<8x96xf32> to vector<8x8xf32>
    %cst_19 = arith.constant dense<0.000000e+00> : vector<8x8xf32>
    %38 = tpu.matmul %35, %36, %cst_19 {dimension_numbers = #tpu.dot_dimension_numbers<[1], [1], [0], [0], [0, 0, 1, 0], [], []>} : vector<8x8xf32>, vector<8x8xf32>, vector<8x8xf32> -> vector<8x8xf32>
    %cst_20 = arith.constant 0.353553385 : f32
    %39 = vector.broadcast %cst_20 : f32 to vector<8x8xf32>
    %40 = arith.mulf %38, %39 : vector<8x8xf32>
    %41 = arith.addf %40, %1 : vector<8x8xf32>
    %cst_21 = arith.constant dense<0xFF800000> : vector<8xf32>
    %42 = vector.multi_reduction <maximumf>, %41, %cst_21 [1] : vector<8x8xf32> to vector<8xf32>
    %43 = vector.shape_cast %42 : vector<8xf32> to vector<8x1xf32>
    %44 = vector.broadcast %43 : vector<8x1xf32> to vector<8x8xf32>
    %45 = arith.subf %41, %44 : vector<8x8xf32>
    %46 = math.exp %45 : vector<8x8xf32>
    %cst_22 = arith.constant dense<0.000000e+00> : vector<8xf32>
    %47 = vector.multi_reduction <add>, %46, %cst_22 [1] : vector<8x8xf32> to vector<8xf32>
    %48 = vector.shape_cast %47 : vector<8xf32> to vector<8x1xf32>
    %49 = tpu.reciprocal %48 {approx = true} : vector<8x1xf32> -> vector<8x1xf32>
    %50 = vector.broadcast %49 : vector<8x1xf32> to vector<8x8xf32>
    %51 = arith.mulf %46, %50 : vector<8x8xf32>
    %cst_23 = arith.constant dense<0.000000e+00> : vector<8x8xf32>
    %52 = tpu.matmul %51, %37, %cst_23 {dimension_numbers = #tpu.dot_dimension_numbers<[1], [0], [0], [1], [0, 0, 1, 1], [], []>} : vector<8x8xf32>, vector<8x8xf32>, vector<8x8xf32> -> vector<8x8xf32>
    %53 = vector.extract_strided_slice %2 {offsets = [0, 8], sizes = [1, 8], strides = [1, 1]} : vector<1x32xf32> to vector<1x8xf32>
    %54 = vector.broadcast %53 : vector<1x8xf32> to vector<8x8xf32>
    %55 = arith.mulf %52, %54 : vector<8x8xf32>
    %56 = vector.extract_strided_slice %3 {offsets = [8, 0], sizes = [8, 32], strides = [1, 1]} : vector<32x32xf32> to vector<8x32xf32>
    %cst_24 = arith.constant dense<0.000000e+00> : vector<8x32xf32>
    %57 = tpu.matmul %55, %56, %cst_24 {dimension_numbers = #tpu.dot_dimension_numbers<[1], [0], [0], [1], [0, 0, 1, 1], [], []>} : vector<8x8xf32>, vector<8x32xf32>, vector<8x32xf32> -> vector<8x32xf32>
    %58 = arith.addf %34, %57 : vector<8x32xf32>
    %59 = vector.extract_strided_slice %8 {offsets = [0, 16], sizes = [8, 8], strides = [1, 1]} : vector<8x96xf32> to vector<8x8xf32>
    %60 = vector.extract_strided_slice %8 {offsets = [0, 48], sizes = [8, 8], strides = [1, 1]} : vector<8x96xf32> to vector<8x8xf32>
    %61 = vector.extract_strided_slice %8 {offsets = [0, 80], sizes = [8, 8], strides = [1, 1]} : vector<8x96xf32> to vector<8x8xf32>
    %cst_25 = arith.constant dense<0.000000e+00> : vector<8x8xf32>
    %62 = tpu.matmul %59, %60, %cst_25 {dimension_numbers = #tpu.dot_dimension_numbers<[1], [1], [0], [0], [0, 0, 1, 0], [], []>} : vector<8x8xf32>, vector<8x8xf32>, vector<8x8xf32> -> vector<8x8xf32>
    %cst_26 = arith.constant 0.353553385 : f32
    %63 = vector.broadcast %cst_26 : f32 to vector<8x8xf32>
    %64 = arith.mulf %62, %63 : vector<8x8xf32>
    %65 = arith.addf %64, %1 : vector<8x8xf32>
    %cst_27 = arith.constant dense<0xFF800000> : vector<8xf32>
    %66 = vector.multi_reduction <maximumf>, %65, %cst_27 [1] : vector<8x8xf32> to vector<8xf32>
    %67 = vector.shape_cast %66 : vector<8xf32> to vector<8x1xf32>
    %68 = vector.broadcast %67 : vector<8x1xf32> to vector<8x8xf32>
    %69 = arith.subf %65, %68 : vector<8x8xf32>
    %70 = math.exp %69 : vector<8x8xf32>
    %cst_28 = arith.constant dense<0.000000e+00> : vector<8xf32>
    %71 = vector.multi_reduction <add>, %70, %cst_28 [1] : vector<8x8xf32> to vector<8xf32>
    %72 = vector.shape_cast %71 : vector<8xf32> to vector<8x1xf32>
    %73 = tpu.reciprocal %72 {approx = true} : vector<8x1xf32> -> vector<8x1xf32>
    %74 = vector.broadcast %73 : vector<8x1xf32> to vector<8x8xf32>
    %75 = arith.mulf %70, %74 : vector<8x8xf32>
    %cst_29 = arith.constant dense<0.000000e+00> : vector<8x8xf32>
    %76 = tpu.matmul %75, %61, %cst_29 {dimension_numbers = #tpu.dot_dimension_numbers<[1], [0], [0], [1], [0, 0, 1, 1], [], []>} : vector<8x8xf32>, vector<8x8xf32>, vector<8x8xf32> -> vector<8x8xf32>
    %77 = vector.extract_strided_slice %2 {offsets = [0, 16], sizes = [1, 8], strides = [1, 1]} : vector<1x32xf32> to vector<1x8xf32>
    %78 = vector.broadcast %77 : vector<1x8xf32> to vector<8x8xf32>
    %79 = arith.mulf %76, %78 : vector<8x8xf32>
    %80 = vector.extract_strided_slice %3 {offsets = [16, 0], sizes = [8, 32], strides = [1, 1]} : vector<32x32xf32> to vector<8x32xf32>
    %cst_30 = arith.constant dense<0.000000e+00> : vector<8x32xf32>
    %81 = tpu.matmul %79, %80, %cst_30 {dimension_numbers = #tpu.dot_dimension_numbers<[1], [0], [0], [1], [0, 0, 1, 1], [], []>} : vector<8x8xf32>, vector<8x32xf32>, vector<8x32xf32> -> vector<8x32xf32>
    %82 = arith.addf %58, %81 : vector<8x32xf32>
    %83 = vector.extract_strided_slice %8 {offsets = [0, 24], sizes = [8, 8], strides = [1, 1]} : vector<8x96xf32> to vector<8x8xf32>
    %84 = vector.extract_strided_slice %8 {offsets = [0, 56], sizes = [8, 8], strides = [1, 1]} : vector<8x96xf32> to vector<8x8xf32>
    %85 = vector.extract_strided_slice %8 {offsets = [0, 88], sizes = [8, 8], strides = [1, 1]} : vector<8x96xf32> to vector<8x8xf32>
    %cst_31 = arith.constant dense<0.000000e+00> : vector<8x8xf32>
    %86 = tpu.matmul %83, %84, %cst_31 {dimension_numbers = #tpu.dot_dimension_numbers<[1], [1], [0], [0], [0, 0, 1, 0], [], []>} : vector<8x8xf32>, vector<8x8xf32>, vector<8x8xf32> -> vector<8x8xf32>
    %cst_32 = arith.constant 0.353553385 : f32
    %87 = vector.broadcast %cst_32 : f32 to vector<8x8xf32>
    %88 = arith.mulf %86, %87 : vector<8x8xf32>
    %89 = arith.addf %88, %1 : vector<8x8xf32>
    %cst_33 = arith.constant dense<0xFF800000> : vector<8xf32>
    %90 = vector.multi_reduction <maximumf>, %89, %cst_33 [1] : vector<8x8xf32> to vector<8xf32>
    %91 = vector.shape_cast %90 : vector<8xf32> to vector<8x1xf32>
    %92 = vector.broadcast %91 : vector<8x1xf32> to vector<8x8xf32>
    %93 = arith.subf %89, %92 : vector<8x8xf32>
    %94 = math.exp %93 : vector<8x8xf32>
    %cst_34 = arith.constant dense<0.000000e+00> : vector<8xf32>
    %95 = vector.multi_reduction <add>, %94, %cst_34 [1] : vector<8x8xf32> to vector<8xf32>
    %96 = vector.shape_cast %95 : vector<8xf32> to vector<8x1xf32>
    %97 = tpu.reciprocal %96 {approx = true} : vector<8x1xf32> -> vector<8x1xf32>
    %98 = vector.broadcast %97 : vector<8x1xf32> to vector<8x8xf32>
    %99 = arith.mulf %94, %98 : vector<8x8xf32>
    %cst_35 = arith.constant dense<0.000000e+00> : vector<8x8xf32>
    %100 = tpu.matmul %99, %85, %cst_35 {dimension_numbers = #tpu.dot_dimension_numbers<[1], [0], [0], [1], [0, 0, 1, 1], [], []>} : vector<8x8xf32>, vector<8x8xf32>, vector<8x8xf32> -> vector<8x8xf32>
    %101 = vector.extract_strided_slice %2 {offsets = [0, 24], sizes = [1, 8], strides = [1, 1]} : vector<1x32xf32> to vector<1x8xf32>
    %102 = vector.broadcast %101 : vector<1x8xf32> to vector<8x8xf32>
    %103 = arith.mulf %100, %102 : vector<8x8xf32>
    %104 = vector.extract_strided_slice %3 {offsets = [24, 0], sizes = [8, 32], strides = [1, 1]} : vector<32x32xf32> to vector<8x32xf32>
    %cst_36 = arith.constant dense<0.000000e+00> : vector<8x32xf32>
    %105 = tpu.matmul %103, %104, %cst_36 {dimension_numbers = #tpu.dot_dimension_numbers<[1], [0], [0], [1], [0, 0, 1, 1], [], []>} : vector<8x8xf32>, vector<8x32xf32>, vector<8x32xf32> -> vector<8x32xf32>
    %106 = arith.addf %82, %105 : vector<8x32xf32>
    %107 = arith.addf %106, %0 : vector<8x32xf32>
    %c0_37 = arith.constant 0 : index
    %c0_38 = arith.constant 0 : index
    %108 = vector.load %arg8[%c0_37, %c0_38] : memref<1x32xf32, #tpu.memory_space<vmem>>, vector<1x32xf32>
    %c0_39 = arith.constant 0 : index
    %c0_40 = arith.constant 0 : index
    %109 = vector.load %arg9[%c0_39, %c0_40] : memref<1x32xf32, #tpu.memory_space<vmem>>, vector<1x32xf32>
    %cst_41 = arith.constant dense<0.000000e+00> : vector<8xf32>
    %110 = vector.multi_reduction <add>, %107, %cst_41 [1] : vector<8x32xf32> to vector<8xf32>
    %111 = vector.shape_cast %110 : vector<8xf32> to vector<8x1xf32>
    %cst_42 = arith.constant 3.200000e+01 : f32
    %112 = vector.broadcast %cst_42 : f32 to vector<8x1xf32>
    %113 = arith.divf %111, %112 : vector<8x1xf32>
    %114 = vector.broadcast %113 : vector<8x1xf32> to vector<8x32xf32>
    %115 = arith.subf %107, %114 : vector<8x32xf32>
    %116 = arith.mulf %115, %115 : vector<8x32xf32>
    %cst_43 = arith.constant dense<0.000000e+00> : vector<8xf32>
    %117 = vector.multi_reduction <add>, %116, %cst_43 [1] : vector<8x32xf32> to vector<8xf32>
    %118 = vector.shape_cast %117 : vector<8xf32> to vector<8x1xf32>
    %cst_44 = arith.constant 3.200000e+01 : f32
    %119 = vector.broadcast %cst_44 : f32 to vector<8x1xf32>
    %120 = arith.divf %118, %119 : vector<8x1xf32>
    %121 = vector.broadcast %113 : vector<8x1xf32> to vector<8x32xf32>
    %122 = arith.subf %107, %121 : vector<8x32xf32>
    %cst_45 = arith.constant 9.99999996E-13 : f32
    %123 = vector.broadcast %cst_45 : f32 to vector<8x1xf32>
    %124 = arith.addf %120, %123 : vector<8x1xf32>
    %125 = math.rsqrt %124 : vector<8x1xf32>
    %126 = vector.broadcast %125 : vector<8x1xf32> to vector<8x32xf32>
    %127 = arith.mulf %122, %126 : vector<8x32xf32>
    %128 = vector.broadcast %108 : vector<1x32xf32> to vector<8x32xf32>
    %129 = arith.mulf %127, %128 : vector<8x32xf32>
    %130 = vector.broadcast %109 : vector<1x32xf32> to vector<8x32xf32>
    %131 = arith.addf %129, %130 : vector<8x32xf32>
    %c0_46 = arith.constant 0 : index
    %c0_47 = arith.constant 0 : index
    %132 = vector.load %arg10[%c0_46, %c0_47] : memref<32x64xf32, #tpu.memory_space<vmem>>, vector<32x64xf32>
    %cst_48 = arith.constant dense<0.000000e+00> : vector<8x64xf32>
    %133 = tpu.matmul %131, %132, %cst_48 {dimension_numbers = #tpu.dot_dimension_numbers<[1], [0], [0], [1], [0, 0, 1, 1], [], []>} : vector<8x32xf32>, vector<32x64xf32>, vector<8x64xf32> -> vector<8x64xf32>
    %c0_49 = arith.constant 0 : index
    %c0_50 = arith.constant 0 : index
    %134 = vector.load %arg11[%c0_49, %c0_50] : memref<1x64xf32, #tpu.memory_space<vmem>>, vector<1x64xf32>
    %135 = vector.broadcast %134 : vector<1x64xf32> to vector<8x64xf32>
    %136 = arith.addf %133, %135 : vector<8x64xf32>
    %cst_51 = arith.constant 5.000000e-01 : f32
    %137 = vector.broadcast %cst_51 : f32 to vector<8x64xf32>
    %138 = arith.mulf %137, %136 : vector<8x64xf32>
    %cst_52 = arith.constant 4.471500e-02 : f32
    %139 = vector.broadcast %cst_52 : f32 to vector<8x64xf32>
    %140 = arith.mulf %139, %136 : vector<8x64xf32>
    %141 = arith.mulf %140, %136 : vector<8x64xf32>
    %142 = arith.mulf %141, %136 : vector<8x64xf32>
    %143 = arith.addf %136, %142 : vector<8x64xf32>
    %cst_53 = arith.constant 0.797884583 : f32
    %144 = vector.broadcast %cst_53 : f32 to vector<8x64xf32>
    %145 = arith.mulf %144, %143 : vector<8x64xf32>
    %146 = math.tanh %145 : vector<8x64xf32>
    %cst_54 = arith.constant 1.000000e+00 : f32
    %147 = vector.broadcast %cst_54 : f32 to vector<8x64xf32>
    %148 = arith.addf %147, %146 : vector<8x64xf32>
    %149 = arith.mulf %138, %148 : vector<8x64xf32>
    %c0_55 = arith.constant 0 : index
    %c0_56 = arith.constant 0 : index
    %150 = vector.load %arg12[%c0_55, %c0_56] : memref<64x32xf32, #tpu.memory_space<vmem>>, vector<64x32xf32>
    %cst_57 = arith.constant dense<0.000000e+00> : vector<8x32xf32>
    %151 = tpu.matmul %149, %150, %cst_57 {dimension_numbers = #tpu.dot_dimension_numbers<[1], [0], [0], [1], [0, 0, 1, 1], [], []>} : vector<8x64xf32>, vector<64x32xf32>, vector<8x32xf32> -> vector<8x32xf32>
    %c0_58 = arith.constant 0 : index
    %c0_59 = arith.constant 0 : index
    %152 = vector.load %arg13[%c0_58, %c0_59] : memref<1x32xf32, #tpu.memory_space<vmem>>, vector<1x32xf32>
    %153 = vector.broadcast %152 : vector<1x32xf32> to vector<8x32xf32>
    %154 = arith.addf %151, %153 : vector<8x32xf32>
    %155 = arith.addf %154, %131 : vector<8x32xf32>
    %c0_60 = arith.constant 0 : index
    %c0_61 = arith.constant 0 : index
    %156 = vector.load %arg14[%c0_60, %c0_61] : memref<1x32xf32, #tpu.memory_space<vmem>>, vector<1x32xf32>
    %c0_62 = arith.constant 0 : index
    %c0_63 = arith.constant 0 : index
    %157 = vector.load %arg15[%c0_62, %c0_63] : memref<1x32xf32, #tpu.memory_space<vmem>>, vector<1x32xf32>
    %cst_64 = arith.constant dense<0.000000e+00> : vector<8xf32>
    %158 = vector.multi_reduction <add>, %155, %cst_64 [1] : vector<8x32xf32> to vector<8xf32>
    %159 = vector.shape_cast %158 : vector<8xf32> to vector<8x1xf32>
    %cst_65 = arith.constant 3.200000e+01 : f32
    %160 = vector.broadcast %cst_65 : f32 to vector<8x1xf32>
    %161 = arith.divf %159, %160 : vector<8x1xf32>
    %162 = vector.broadcast %161 : vector<8x1xf32> to vector<8x32xf32>
    %163 = arith.subf %155, %162 : vector<8x32xf32>
    %164 = arith.mulf %163, %163 : vector<8x32xf32>
    %cst_66 = arith.constant dense<0.000000e+00> : vector<8xf32>
    %165 = vector.multi_reduction <add>, %164, %cst_66 [1] : vector<8x32xf32> to vector<8xf32>
    %166 = vector.shape_cast %165 : vector<8xf32> to vector<8x1xf32>
    %cst_67 = arith.constant 3.200000e+01 : f32
    %167 = vector.broadcast %cst_67 : f32 to vector<8x1xf32>
    %168 = arith.divf %166, %167 : vector<8x1xf32>
    %169 = vector.broadcast %161 : vector<8x1xf32> to vector<8x32xf32>
    %170 = arith.subf %155, %169 : vector<8x32xf32>
    %cst_68 = arith.constant 9.99999996E-13 : f32
    %171 = vector.broadcast %cst_68 : f32 to vector<8x1xf32>
    %172 = arith.addf %168, %171 : vector<8x1xf32>
    %173 = math.rsqrt %172 : vector<8x1xf32>
    %174 = vector.broadcast %173 : vector<8x1xf32> to vector<8x32xf32>
    %175 = arith.mulf %170, %174 : vector<8x32xf32>
    %176 = vector.broadcast %156 : vector<1x32xf32> to vector<8x32xf32>
    %177 = arith.mulf %175, %176 : vector<8x32xf32>
    %178 = vector.broadcast %157 : vector<1x32xf32> to vector<8x32xf32>
    %179 = arith.addf %177, %178 : vector<8x32xf32>
    %c0_69 = arith.constant 0 : index
    %c0_70 = arith.constant 0 : index
    %180 = vector.load %arg16[%c0_69, %c0_70] : memref<8x32xf32, #tpu.memory_space<vmem>>, vector<8x32xf32>
    tpu.vector_store %arg16[%c0_69, %c0_70], %179 {strides = array<i32>} : memref<8x32xf32, #tpu.memory_space<vmem>>, vector<8x32xf32>,
    return
  }
  func.func @transform_0(%arg0: i32) -> (i32, i32) {
    %c0_i32 = arith.constant 0 : i32
    %c0_i32_0 = arith.constant 0 : i32
    return %arg0, %c0_i32 : i32, i32
  }
  func.func @transform_1(%arg0: i32) -> (i32, i32) {
    %c0_i32 = arith.constant 0 : i32
    %c0_i32_0 = arith.constant 0 : i32
    return %arg0, %c0_i32 : i32, i32
  }
  func.func @transform_2(%arg0: i32) -> (i32, i32) {
    %c0_i32 = arith.constant 0 : i32
    %c0_i32_0 = arith.constant 0 : i32
    %c0_i32_1 = arith.constant 0 : i32
    return %c0_i32, %c0_i32_0 : i32, i32
  }
  func.func @transform_3(%arg0: i32) -> (i32, i32) {
    %c0_i32 = arith.constant 0 : i32
    %c0_i32_0 = arith.constant 0 : i32
    %c0_i32_1 = arith.constant 0 : i32
    return %c0_i32, %c0_i32_0 : i32, i32
  }
  func.func @transform_4(%arg0: i32) -> (i32, i32) {
    %c0_i32 = arith.constant 0 : i32
    %c0_i32_0 = arith.constant 0 : i32
    %c0_i32_1 = arith.constant 0 : i32
    return %c0_i32, %c0_i32_0 : i32, i32
  }
  func.func @transform_5(%arg0: i32) -> (i32, i32) {
    %c0_i32 = arith.constant 0 : i32
    %c0_i32_0 = arith.constant 0 : i32
    %c0_i32_1 = arith.constant 0 : i32
    return %c0_i32, %c0_i32_0 : i32, i32
  }
  func.func @transform_6(%arg0: i32) -> (i32, i32) {
    %c0_i32 = arith.constant 0 : i32
    %c0_i32_0 = arith.constant 0 : i32
    %c0_i32_1 = arith.constant 0 : i32
    return %c0_i32, %c0_i32_0 : i32, i32
  }
  func.func @transform_7(%arg0: i32) -> (i32, i32) {
    %c0_i32 = arith.constant 0 : i32
    %c0_i32_0 = arith.constant 0 : i32
    %c0_i32_1 = arith.constant 0 : i32
    return %c0_i32, %c0_i32_0 : i32, i32
  }
  func.func @transform_8(%arg0: i32) -> (i32, i32) {
    %c0_i32 = arith.constant 0 : i32
    %c0_i32_0 = arith.constant 0 : i32
    %c0_i32_1 = arith.constant 0 : i32
    return %c0_i32, %c0_i32_0 : i32, i32
  }
  func.func @transform_9(%arg0: i32) -> (i32, i32) {
    %c0_i32 = arith.constant 0 : i32
    %c0_i32_0 = arith.constant 0 : i32
    %c0_i32_1 = arith.constant 0 : i32
    return %c0_i32, %c0_i32_0 : i32, i32
  }
  func.func @transform_10(%arg0: i32) -> (i32, i32) {
    %c0_i32 = arith.constant 0 : i32
    %c0_i32_0 = arith.constant 0 : i32
    %c0_i32_1 = arith.constant 0 : i32
    return %c0_i32, %c0_i32_0 : i32, i32
  }
  func.func @transform_11(%arg0: i32) -> (i32, i32) {
    %c0_i32 = arith.constant 0 : i32
    %c0_i32_0 = arith.constant 0 : i32
    %c0_i32_1 = arith.constant 0 : i32
    return %c0_i32, %c0_i32_0 : i32, i32
  }
  func.func @transform_12(%arg0: i32) -> (i32, i32) {
    %c0_i32 = arith.constant 0 : i32
    %c0_i32_0 = arith.constant 0 : i32
    %c0_i32_1 = arith.constant 0 : i32
    return %c0_i32, %c0_i32_0 : i32, i32
  }
  func.func @transform_13(%arg0: i32) -> (i32, i32) {
    %c0_i32 = arith.constant 0 : i32
    %c0_i32_0 = arith.constant 0 : i32
    %c0_i32_1 = arith.constant 0 : i32
    return %c0_i32, %c0_i32_0 : i32, i32
  }
  func.func @transform_14(%arg0: i32) -> (i32, i32) {
    %c0_i32 = arith.constant 0 : i32
    %c0_i32_0 = arith.constant 0 : i32
    %c0_i32_1 = arith.constant 0 : i32
    return %c0_i32, %c0_i32_0 : i32, i32
  }
  func.func @transform_15(%arg0: i32) -> (i32, i32) {
    %c0_i32 = arith.constant 0 : i32
    %c0_i32_0 = arith.constant 0 : i32
    return %arg0, %c0_i32 : i32, i32
  }
}

module attributes {stable_mosaic.version = 11 : i64} {
  func.func @_bert_layer_kernel(%arg0: i32, %arg1: memref<8x32xf32, #tpu.memory_space<vmem>>, %arg2: memref<8x8xf32, #tpu.memory_space<vmem>>, %arg3: memref<1x32xf32, #tpu.memory_space<vmem>>, %arg4: memref<32x96xf32, #tpu.memory_space<vmem>>, %arg5: memref<1x96xf32, #tpu.memory_space<vmem>>, %arg6: memref<32x32xf32, #tpu.memory_space<vmem>>, %arg7: memref<1x32xf32, #tpu.memory_space<vmem>>, %arg8: memref<1x32xf32, #tpu.memory_space<vmem>>, %arg9: memref<1x32xf32, #tpu.memory_space<vmem>>, %arg10: memref<32x64xf32, #tpu.memory_space<vmem>>, %arg11: memref<1x64xf32, #tpu.memory_space<vmem>>, %arg12: memref<64x32xf32, #tpu.memory_space<vmem>>, %arg13: memref<1x32xf32, #tpu.memory_space<vmem>>, %arg14: memref<1x32xf32, #tpu.memory_space<vmem>>, %arg15: memref<1x32xf32, #tpu.memory_space<vmem>>, %arg16: memref<8x32xf32, #tpu.memory_space<vmem>>) attributes {dimension_semantics = [#tpu.dimension_semantics<parallel>], iteration_bounds = array<i64: 2>, scalar_prefetch = 0 : i64, scratch_operands = 0 : i64, tpu.core_type = #tpu.core_type<tc>, window_params = [{transform_indices = @transform_0, window_bounds = array<i64: 8, 32>}, {transform_indices = @transform_1, window_bounds = array<i64: 8, 8>}, {pipeline_mode = #tpu.pipeline_mode<synchronous>, transform_indices = @transform_2, window_bounds = array<i64: 1, 32>}, {pipeline_mode = #tpu.pipeline_mode<synchronous>, transform_indices = @transform_3, window_bounds = array<i64: 32, 96>}, {pipeline_mode = #tpu.pipeline_mode<synchronous>, transform_indices = @transform_4, window_bounds = array<i64: 1, 96>}, {pipeline_mode = #tpu.pipeline_mode<synchronous>, transform_indices = @transform_5, window_bounds = array<i64: 32, 32>}, {pipeline_mode = #tpu.pipeline_mode<synchronous>, transform_indices = @transform_6, window_bounds = array<i64: 1, 32>}, {pipeline_mode = #tpu.pipeline_mode<synchronous>, transform_indices = @transform_7, window_bounds = array<i64: 1, 32>}, {pipeline_mode = #tpu.pipeline_mode<synchronous>, transform_indices = @transform_8, window_bounds = array<i64: 1, 32>}, {pipeline_mode = #tpu.pipeline_mode<synchronous>, transform_indices = @transform_9, window_bounds = array<i64: 32, 64>}, {pipeline_mode = #tpu.pipeline_mode<synchronous>, transform_indices = @transform_10, window_bounds = array<i64: 1, 64>}, {pipeline_mode = #tpu.pipeline_mode<synchronous>, transform_indices = @transform_11, window_bounds = array<i64: 64, 32>}, {pipeline_mode = #tpu.pipeline_mode<synchronous>, transform_indices = @transform_12, window_bounds = array<i64: 1, 32>}, {pipeline_mode = #tpu.pipeline_mode<synchronous>, transform_indices = @transform_13, window_bounds = array<i64: 1, 32>}, {pipeline_mode = #tpu.pipeline_mode<synchronous>, transform_indices = @transform_14, window_bounds = array<i64: 1, 32>}, {transform_indices = @transform_15, window_bounds = array<i64: 8, 32>}]} {
    %c0 = arith.constant 0 : index
    %c0_0 = arith.constant 0 : index
    %0 = vector.load %arg1[%c0, %c0_0] : memref<8x32xf32, #tpu.memory_space<vmem>>, vector<8x32xf32>
    %c0_1 = arith.constant 0 : index
    %c0_2 = arith.constant 0 : index
    %1 = vector.load %arg2[%c0_1, %c0_2] : memref<8x8xf32, #tpu.memory_space<vmem>>, vector<8x8xf32>
    %c0_3 = arith.constant 0 : index
    %c0_4 = arith.constant 0 : index
    %2 = vector.load %arg3[%c0_3, %c0_4] : memref<1x32xf32, #tpu.memory_space<vmem>>, vector<1x32xf32>
    %c0_5 = arith.constant 0 : index
    %c0_6 = arith.constant 0 : index
    %3 = vector.load %arg6[%c0_5, %c0_6] : memref<32x32xf32, #tpu.memory_space<vmem>>, vector<32x32xf32>
    %c0_7 = arith.constant 0 : index
    %c0_8 = arith.constant 0 : index
    %4 = vector.load %arg4[%c0_7, %c0_8] : memref<32x96xf32, #tpu.memory_space<vmem>>, vector<32x96xf32>
    %cst = arith.constant dense<0.000000e+00> : vector<8x96xf32>
    %5 = tpu.matmul %0, %4, %cst {dimension_numbers = #tpu.dot_dimension_numbers<[1], [0], [0], [1], [0, 0, 1, 1], [], []>} : vector<8x32xf32>, vector<32x96xf32>, vector<8x96xf32> -> vector<8x96xf32>
    %c0_9 = arith.constant 0 : index
    %c0_10 = arith.constant 0 : index
    %6 = vector.load %arg5[%c0_9, %c0_10] : memref<1x96xf32, #tpu.memory_space<vmem>>, vector<1x96xf32>
    %7 = vector.broadcast %6 : vector<1x96xf32> to vector<8x96xf32>
    %8 = arith.addf %5, %7 : vector<8x96xf32>
    %c0_11 = arith.constant 0 : index
    %c0_12 = arith.constant 0 : index
    %9 = vector.load %arg7[%c0_11, %c0_12] : memref<1x32xf32, #tpu.memory_space<vmem>>, vector<1x32xf32>
    %10 = vector.extract_strided_slice %8 {offsets = [0, 0], sizes = [8, 8], strides = [1, 1]} : vector<8x96xf32> to vector<8x8xf32>
    %11 = vector.extract_strided_slice %8 {offsets = [0, 32], sizes = [8, 8], strides = [1, 1]} : vector<8x96xf32> to vector<8x8xf32>
    %12 = vector.extract_strided_slice %8 {offsets = [0, 64], sizes = [8, 8], strides = [1, 1]} : vector<8x96xf32> to vector<8x8xf32>
    %cst_13 = arith.constant dense<0.000000e+00> : vector<8x8xf32>
    %13 = tpu.matmul %10, %11, %cst_13 {dimension_numbers = #tpu.dot_dimension_numbers<[1], [1], [0], [0], [0, 0, 1, 0], [], []>} : vector<8x8xf32>, vector<8x8xf32>, vector<8x8xf32> -> vector<8x8xf32>
    %cst_14 = arith.constant 0.353553385 : f32
    %14 = vector.broadcast %cst_14 : f32 to vector<8x8xf32>
    %15 = arith.mulf %13, %14 : vector<8x8xf32>
    %16 = arith.addf %15, %1 : vector<8x8xf32>
    %cst_15 = arith.constant dense<0xFF800000> : vector<8xf32>
    %17 = vector.multi_reduction <maximumf>, %16, %cst_15 [1] : vector<8x8xf32> to vector<8xf32>
    %18 = vector.shape_cast %17 : vector<8xf32> to vector<8x1xf32>
    %19 = vector.broadcast %18 : vector<8x1xf32> to vector<8x8xf32>
    %20 = arith.subf %16, %19 : vector<8x8xf32>
    %21 = math.exp %20 : vector<8x8xf32>
    %cst_16 = arith.constant dense<0.000000e+00> : vector<8xf32>
    %22 = vector.multi_reduction <add>, %21, %cst_16 [1] : vector<8x8xf32> to vector<8xf32>
    %23 = vector.shape_cast %22 : vector<8xf32> to vector<8x1xf32>
    %24 = tpu.reciprocal %23 {approx = true} : vector<8x1xf32> -> vector<8x1xf32>
    %25 = vector.broadcast %24 : vector<8x1xf32> to vector<8x8xf32>
    %26 = arith.mulf %21, %25 : vector<8x8xf32>
    %cst_17 = arith.constant dense<0.000000e+00> : vector<8x8xf32>
    %27 = tpu.matmul %26, %12, %cst_17 {dimension_numbers = #tpu.dot_dimension_numbers<[1], [0], [0], [1], [0, 0, 1, 1], [], []>} : vector<8x8xf32>, vector<8x8xf32>, vector<8x8xf32> -> vector<8x8xf32>
    %28 = vector.extract_strided_slice %2 {offsets = [0, 0], sizes = [1, 8], strides = [1, 1]} : vector<1x32xf32> to vector<1x8xf32>
    %29 = vector.broadcast %28 : vector<1x8xf32> to vector<8x8xf32>
    %30 = arith.mulf %27, %29 : vector<8x8xf32>
    %31 = vector.extract_strided_slice %3 {offsets = [0, 0], sizes = [8, 32], strides = [1, 1]} : vector<32x32xf32> to vector<8x32xf32>
    %cst_18 = arith.constant dense<0.000000e+00> : vector<8x32xf32>
    %32 = tpu.matmul %30, %31, %cst_18 {dimension_numbers = #tpu.dot_dimension_numbers<[1], [0], [0], [1], [0, 0, 1, 1], [], []>} : vector<8x8xf32>, vector<8x32xf32>, vector<8x32xf32> -> vector<8x32xf32>
    %33 = vector.broadcast %9 : vector<1x32xf32> to vector<8x32xf32>
    %34 = arith.addf %33, %32 : vector<8x32xf32>
    %35 = vector.extract_strided_slice %8 {offsets = [0, 8], sizes = [8, 8], strides = [1, 1]} : vector<8x96xf32> to vector<8x8xf32>
    %36 = vector.extract_strided_slice %8 {offsets = [0, 40], sizes = [8, 8], strides = [1, 1]} : vector<8x96xf32> to vector<8x8xf32>
    %37 = vector.extract_strided_slice %8 {offsets = [0, 72], sizes = [8, 8], strides = [1, 1]} : vector<8x96xf32> to vector<8x8xf32>
    %cst_19 = arith.constant dense<0.000000e+00> : vector<8x8xf32>
    %38 = tpu.matmul %35, %36, %cst_19 {dimension_numbers = #tpu.dot_dimension_numbers<[1], [1], [0], [0], [0, 0, 1, 0], [], []>} : vector<8x8xf32>, vector<8x8xf32>, vector<8x8xf32> -> vector<8x8xf32>
    %cst_20 = arith.constant 0.353553385 : f32
    %39 = vector.broadcast %cst_20 : f32 to vector<8x8xf32>
    %40 = arith.mulf %38, %39 : vector<8x8xf32>
    %41 = arith.addf %40, %1 : vector<8x8xf32>
    %cst_21 = arith.constant dense<0xFF800000> : vector<8xf32>
    %42 = vector.multi_reduction <maximumf>, %41, %cst_21 [1] : vector<8x8xf32> to vector<8xf32>
    %43 = vector.shape_cast %42 : vector<8xf32> to vector<8x1xf32>
    %44 = vector.broadcast %43 : vector<8x1xf32> to vector<8x8xf32>
    %45 = arith.subf %41, %44 : vector<8x8xf32>
    %46 = math.exp %45 : vector<8x8xf32>
    %cst_22 = arith.constant dense<0.000000e+00> : vector<8xf32>
    %47 = vector.multi_reduction <add>, %46, %cst_22 [1] : vector<8x8xf32> to vector<8xf32>
    %48 = vector.shape_cast %47 : vector<8xf32> to vector<8x1xf32>
    %49 = tpu.reciprocal %48 {approx = true} : vector<8x1xf32> -> vector<8x1xf32>
    %50 = vector.broadcast %49 : vector<8x1xf32> to vector<8x8xf32>
    %51 = arith.mulf %46, %50 : vector<8x8xf32>
    %cst_23 = arith.constant dense<0.000000e+00> : vector<8x8xf32>
    %52 = tpu.matmul %51, %37, %cst_23 {dimension_numbers = #tpu.dot_dimension_numbers<[1], [0], [0], [1], [0, 0, 1, 1], [], []>} : vector<8x8xf32>, vector<8x8xf32>, vector<8x8xf32> -> vector<8x8xf32>
    %53 = vector.extract_strided_slice %2 {offsets = [0, 8], sizes = [1, 8], strides = [1, 1]} : vector<1x32xf32> to vector<1x8xf32>
    %54 = vector.broadcast %53 : vector<1x8xf32> to vector<8x8xf32>
    %55 = arith.mulf %52, %54 : vector<8x8xf32>
    %56 = vector.extract_strided_slice %3 {offsets = [8, 0], sizes = [8, 32], strides = [1, 1]} : vector<32x32xf32> to vector<8x32xf32>
    %cst_24 = arith.constant dense<0.000000e+00> : vector<8x32xf32>
    %57 = tpu.matmul %55, %56, %cst_24 {dimension_numbers = #tpu.dot_dimension_numbers<[1], [0], [0], [1], [0, 0, 1, 1], [], []>} : vector<8x8xf32>, vector<8x32xf32>, vector<8x32xf32> -> vector<8x32xf32>
    %58 = arith.addf %34, %57 : vector<8x32xf32>
    %59 = vector.extract_strided_slice %8 {offsets = [0, 16], sizes = [8, 8], strides = [1, 1]} : vector<8x96xf32> to vector<8x8xf32>
    %60 = vector.extract_strided_slice %8 {offsets = [0, 48], sizes = [8, 8], strides = [1, 1]} : vector<8x96xf32> to vector<8x8xf32>
    %61 = vector.extract_strided_slice %8 {offsets = [0, 80], sizes = [8, 8], strides = [1, 1]} : vector<8x96xf32> to vector<8x8xf32>
    %cst_25 = arith.constant dense<0.000000e+00> : vector<8x8xf32>
    %62 = tpu.matmul %59, %60, %cst_25 {dimension_numbers = #tpu.dot_dimension_numbers<[1], [1], [0], [0], [0, 0, 1, 0], [], []>} : vector<8x8xf32>, vector<8x8xf32>, vector<8x8xf32> -> vector<8x8xf32>
    %cst_26 = arith.constant 0.353553385 : f32
    %63 = vector.broadcast %cst_26 : f32 to vector<8x8xf32>
    %64 = arith.mulf %62, %63 : vector<8x8xf32>
    %65 = arith.addf %64, %1 : vector<8x8xf32>
    %cst_27 = arith.constant dense<0xFF800000> : vector<8xf32>
    %66 = vector.multi_reduction <maximumf>, %65, %cst_27 [1] : vector<8x8xf32> to vector<8xf32>
    %67 = vector.shape_cast %66 : vector<8xf32> to vector<8x1xf32>
    %68 = vector.broadcast %67 : vector<8x1xf32> to vector<8x8xf32>
    %69 = arith.subf %65, %68 : vector<8x8xf32>
    %70 = math.exp %69 : vector<8x8xf32>
    %cst_28 = arith.constant dense<0.000000e+00> : vector<8xf32>
    %71 = vector.multi_reduction <add>, %70, %cst_28 [1] : vector<8x8xf32> to vector<8xf32>
    %72 = vector.shape_cast %71 : vector<8xf32> to vector<8x1xf32>
    %73 = tpu.reciprocal %72 {approx = true} : vector<8x1xf32> -> vector<8x1xf32>
    %74 = vector.broadcast %73 : vector<8x1xf32> to vector<8x8xf32>
    %75 = arith.mulf %70, %74 : vector<8x8xf32>
    %cst_29 = arith.constant dense<0.000000e+00> : vector<8x8xf32>
    %76 = tpu.matmul %75, %61, %cst_29 {dimension_numbers = #tpu.dot_dimension_numbers<[1], [0], [0], [1], [0, 0, 1, 1], [], []>} : vector<8x8xf32>, vector<8x8xf32>, vector<8x8xf32> -> vector<8x8xf32>
    %77 = vector.extract_strided_slice %2 {offsets = [0, 16], sizes = [1, 8], strides = [1, 1]} : vector<1x32xf32> to vector<1x8xf32>
    %78 = vector.broadcast %77 : vector<1x8xf32> to vector<8x8xf32>
    %79 = arith.mulf %76, %78 : vector<8x8xf32>
    %80 = vector.extract_strided_slice %3 {offsets = [16, 0], sizes = [8, 32], strides = [1, 1]} : vector<32x32xf32> to vector<8x32xf32>
    %cst_30 = arith.constant dense<0.000000e+00> : vector<8x32xf32>
    %81 = tpu.matmul %79, %80, %cst_30 {dimension_numbers = #tpu.dot_dimension_numbers<[1], [0], [0], [1], [0, 0, 1, 1], [], []>} : vector<8x8xf32>, vector<8x32xf32>, vector<8x32xf32> -> vector<8x32xf32>
    %82 = arith.addf %58, %81 : vector<8x32xf32>
    %83 = vector.extract_strided_slice %8 {offsets = [0, 24], sizes = [8, 8], strides = [1, 1]} : vector<8x96xf32> to vector<8x8xf32>
    %84 = vector.extract_strided_slice %8 {offsets = [0, 56], sizes = [8, 8], strides = [1, 1]} : vector<8x96xf32> to vector<8x8xf32>
    %85 = vector.extract_strided_slice %8 {offsets = [0, 88], sizes = [8, 8], strides = [1, 1]} : vector<8x96xf32> to vector<8x8xf32>
    %cst_31 = arith.constant dense<0.000000e+00> : vector<8x8xf32>
    %86 = tpu.matmul %83, %84, %cst_31 {dimension_numbers = #tpu.dot_dimension_numbers<[1], [1], [0], [0], [0, 0, 1, 0], [], []>} : vector<8x8xf32>, vector<8x8xf32>, vector<8x8xf32> -> vector<8x8xf32>
    %cst_32 = arith.constant 0.353553385 : f32
    %87 = vector.broadcast %cst_32 : f32 to vector<8x8xf32>
    %88 = arith.mulf %86, %87 : vector<8x8xf32>
    %89 = arith.addf %88, %1 : vector<8x8xf32>
    %cst_33 = arith.constant dense<0xFF800000> : vector<8xf32>
    %90 = vector.multi_reduction <maximumf>, %89, %cst_33 [1] : vector<8x8xf32> to vector<8xf32>
    %91 = vector.shape_cast %90 : vector<8xf32> to vector<8x1xf32>
    %92 = vector.broadcast %91 : vector<8x1xf32> to vector<8x8xf32>
    %93 = arith.subf %89, %92 : vector<8x8xf32>
    %94 = math.exp %93 : vector<8x8xf32>
    %cst_34 = arith.constant dense<0.000000e+00> : vector<8xf32>
    %95 = vector.multi_reduction <add>, %94, %cst_34 [1] : vector<8x8xf32> to vector<8xf32>
    %96 = vector.shape_cast %95 : vector<8xf32> to vector<8x1xf32>
    %97 = tpu.reciprocal %96 {approx = true} : vector<8x1xf32> -> vector<8x1xf32>
    %98 = vector.broadcast %97 : vector<8x1xf32> to vector<8x8xf32>
    %99 = arith.mulf %94, %98 : vector<8x8xf32>
    %cst_35 = arith.constant dense<0.000000e+00> : vector<8x8xf32>
    %100 = tpu.matmul %99, %85, %cst_35 {dimension_numbers = #tpu.dot_dimension_numbers<[1], [0], [0], [1], [0, 0, 1, 1], [], []>} : vector<8x8xf32>, vector<8x8xf32>, vector<8x8xf32> -> vector<8x8xf32>
    %101 = vector.extract_strided_slice %2 {offsets = [0, 24], sizes = [1, 8], strides = [1, 1]} : vector<1x32xf32> to vector<1x8xf32>
    %102 = vector.broadcast %101 : vector<1x8xf32> to vector<8x8xf32>
    %103 = arith.mulf %100, %102 : vector<8x8xf32>
    %104 = vector.extract_strided_slice %3 {offsets = [24, 0], sizes = [8, 32], strides = [1, 1]} : vector<32x32xf32> to vector<8x32xf32>
    %cst_36 = arith.constant dense<0.000000e+00> : vector<8x32xf32>
    %105 = tpu.matmul %103, %104, %cst_36 {dimension_numbers = #tpu.dot_dimension_numbers<[1], [0], [0], [1], [0, 0, 1, 1], [], []>} : vector<8x8xf32>, vector<8x32xf32>, vector<8x32xf32> -> vector<8x32xf32>
    %106 = arith.addf %82, %105 : vector<8x32xf32>
    %107 = arith.addf %106, %0 : vector<8x32xf32>
    %c0_37 = arith.constant 0 : index
    %c0_38 = arith.constant 0 : index
    %108 = vector.load %arg8[%c0_37, %c0_38] : memref<1x32xf32, #tpu.memory_space<vmem>>, vector<1x32xf32>
    %c0_39 = arith.constant 0 : index
    %c0_40 = arith.constant 0 : index
    %109 = vector.load %arg9[%c0_39, %c0_40] : memref<1x32xf32, #tpu.memory_space<vmem>>, vector<1x32xf32>
    %cst_41 = arith.constant dense<0.000000e+00> : vector<8xf32>
    %110 = vector.multi_reduction <add>, %107, %cst_41 [1] : vector<8x32xf32> to vector<8xf32>
    %111 = vector.shape_cast %110 : vector<8xf32> to vector<8x1xf32>
    %cst_42 = arith.constant 3.200000e+01 : f32
    %112 = vector.broadcast %cst_42 : f32 to vector<8x1xf32>
    %113 = arith.divf %111, %112 : vector<8x1xf32>
    %114 = vector.broadcast %113 : vector<8x1xf32> to vector<8x32xf32>
    %115 = arith.subf %107, %114 : vector<8x32xf32>
    %116 = arith.mulf %115, %115 : vector<8x32xf32>
    %cst_43 = arith.constant dense<0.000000e+00> : vector<8xf32>
    %117 = vector.multi_reduction <add>, %116, %cst_43 [1] : vector<8x32xf32> to vector<8xf32>
    %118 = vector.shape_cast %117 : vector<8xf32> to vector<8x1xf32>
    %cst_44 = arith.constant 3.200000e+01 : f32
    %119 = vector.broadcast %cst_44 : f32 to vector<8x1xf32>
    %120 = arith.divf %118, %119 : vector<8x1xf32>
    %121 = vector.broadcast %113 : vector<8x1xf32> to vector<8x32xf32>
    %122 = arith.subf %107, %121 : vector<8x32xf32>
    %cst_45 = arith.constant 9.99999996E-13 : f32
    %123 = vector.broadcast %cst_45 : f32 to vector<8x1xf32>
    %124 = arith.addf %120, %123 : vector<8x1xf32>
    %125 = math.rsqrt %124 : vector<8x1xf32>
    %126 = vector.broadcast %125 : vector<8x1xf32> to vector<8x32xf32>
    %127 = arith.mulf %122, %126 : vector<8x32xf32>
    %128 = vector.broadcast %108 : vector<1x32xf32> to vector<8x32xf32>
    %129 = arith.mulf %127, %128 : vector<8x32xf32>
    %130 = vector.broadcast %109 : vector<1x32xf32> to vector<8x32xf32>
    %131 = arith.addf %129, %130 : vector<8x32xf32>
    %c0_46 = arith.constant 0 : index
    %c0_47 = arith.constant 0 : index
    %132 = vector.load %arg10[%c0_46, %c0_47] : memref<32x64xf32, #tpu.memory_space<vmem>>, vector<32x64xf32>
    %cst_48 = arith.constant dense<0.000000e+00> : vector<8x64xf32>
    %133 = tpu.matmul %131, %132, %cst_48 {dimension_numbers = #tpu.dot_dimension_numbers<[1], [0], [0], [1], [0, 0, 1, 1], [], []>} : vector<8x32xf32>, vector<32x64xf32>, vector<8x64xf32> -> vector<8x64xf32>
    %c0_49 = arith.constant 0 : index
    %c0_50 = arith.constant 0 : index
    %134 = vector.load %arg11[%c0_49, %c0_50] : memref<1x64xf32, #tpu.memory_space<vmem>>, vector<1x64xf32>
    %135 = vector.broadcast %134 : vector<1x64xf32> to vector<8x64xf32>
    %136 = arith.addf %133, %135 : vector<8x64xf32>
    %cst_51 = arith.constant 5.000000e-01 : f32
    %137 = vector.broadcast %cst_51 : f32 to vector<8x64xf32>
    %138 = arith.mulf %137, %136 : vector<8x64xf32>
    %cst_52 = arith.constant 4.471500e-02 : f32
    %139 = vector.broadcast %cst_52 : f32 to vector<8x64xf32>
    %140 = arith.mulf %139, %136 : vector<8x64xf32>
    %141 = arith.mulf %140, %136 : vector<8x64xf32>
    %142 = arith.mulf %141, %136 : vector<8x64xf32>
    %143 = arith.addf %136, %142 : vector<8x64xf32>
    %cst_53 = arith.constant 0.797884583 : f32
    %144 = vector.broadcast %cst_53 : f32 to vector<8x64xf32>
    %145 = arith.mulf %144, %143 : vector<8x64xf32>
    %146 = math.tanh %145 : vector<8x64xf32>
    %cst_54 = arith.constant 1.000000e+00 : f32
    %147 = vector.broadcast %cst_54 : f32 to vector<8x64xf32>
    %148 = arith.addf %147, %146 : vector<8x64xf32>
    %149 = arith.mulf %138, %148 : vector<8x64xf32>
    %c0_55 = arith.constant 0 : index
    %c0_56 = arith.constant 0 : index
    %150 = vector.load %arg12[%c0_55, %c0_56] : memref<64x32xf32, #tpu.memory_space<vmem>>, vector<64x32xf32>
    %cst_57 = arith.constant dense<0.000000e+00> : vector<8x32xf32>
    %151 = tpu.matmul %149, %150, %cst_57 {dimension_numbers = #tpu.dot_dimension_numbers<[1], [0], [0], [1], [0, 0, 1, 1], [], []>} : vector<8x64xf32>, vector<64x32xf32>, vector<8x32xf32> -> vector<8x32xf32>
    %c0_58 = arith.constant 0 : index
    %c0_59 = arith.constant 0 : index
    %152 = vector.load %arg13[%c0_58, %c0_59] : memref<1x32xf32, #tpu.memory_space<vmem>>, vector<1x32xf32>
    %153 = vector.broadcast %152 : vector<1x32xf32> to vector<8x32xf32>
    %154 = arith.addf %151, %153 : vector<8x32xf32>
    %155 = arith.addf %154, %131 : vector<8x32xf32>
    %c0_60 = arith.constant 0 : index
    %c0_61 = arith.constant 0 : index
    %156 = vector.load %arg14[%c0_60, %c0_61] : memref<1x32xf32, #tpu.memory_space<vmem>>, vector<1x32xf32>
    %c0_62 = arith.constant 0 : index
    %c0_63 = arith.constant 0 : index
    %157 = vector.load %arg15[%c0_62, %c0_63] : memref<1x32xf32, #tpu.memory_space<vmem>>, vector<1x32xf32>
    %cst_64 = arith.constant dense<0.000000e+00> : vector<8xf32>
    %158 = vector.multi_reduction <add>, %155, %cst_64 [1] : vector<8x32xf32> to vector<8xf32>
    %159 = vector.shape_cast %158 : vector<8xf32> to vector<8x1xf32>
    %cst_65 = arith.constant 3.200000e+01 : f32
    %160 = vector.broadcast %cst_65 : f32 to vector<8x1xf32>
    %161 = arith.divf %159, %160 : vector<8x1xf32>
    %162 = vector.broadcast %161 : vector<8x1xf32> to vector<8x32xf32>
    %163 = arith.subf %155, %162 : vector<8x32xf32>
    %164 = arith.mulf %163, %163 : vector<8x32xf32>
    %cst_66 = arith.constant dense<0.000000e+00> : vector<8xf32>
    %165 = vector.multi_reduction <add>, %164, %cst_66 [1] : vector<8x32xf32> to vector<8xf32>
    %166 = vector.shape_cast %165 : vector<8xf32> to vector<8x1xf32>
    %cst_67 = arith.constant 3.200000e+01 : f32
    %167 = vector.broadcast %cst_67 : f32 to vector<8x1xf32>
    %168 = arith.divf %166, %167 : vector<8x1xf32>
    %169 = vector.broadcast %161 : vector<8x1xf32> to vector<8x32xf32>
    %170 = arith.subf %155, %169 : vector<8x32xf32>
    %cst_68 = arith.constant 9.99999996E-13 : f32
    %171 = vector.broadcast %cst_68 : f32 to vector<8x1xf32>
    %172 = arith.addf %168, %171 : vector<8x1xf32>
    %173 = math.rsqrt %172 : vector<8x1xf32>
    %174 = vector.broadcast %173 : vector<8x1xf32> to vector<8x32xf32>
    %175 = arith.mulf %170, %174 : vector<8x32xf32>
    %176 = vector.broadcast %156 : vector<1x32xf32> to vector<8x32xf32>
    %177 = arith.mulf %175, %176 : vector<8x32xf32>
    %178 = vector.broadcast %157 : vector<1x32xf32> to vector<8x32xf32>
    %179 = arith.addf %177, %178 : vector<8x32xf32>
    %c0_69 = arith.constant 0 : index
    %c0_70 = arith.constant 0 : index
    %180 = vector.load %arg16[%c0_69, %c0_70] : memref<8x32xf32, #tpu.memory_space<vmem>>, vector<8x32xf32>
    tpu.vector_store %arg16[%c0_69, %c0_70], %179 {strides = array<i32>} : memref<8x32xf32, #tpu.memory_space<vmem>>, vector<8x32xf32>,
    return
  }
  func.func @transform_0(%arg0: i32) -> (i32, i32) {
    %c0_i32 = arith.constant 0 : i32
    %c0_i32_0 = arith.constant 0 : i32
    return %arg0, %c0_i32 : i32, i32
  }
  func.func @transform_1(%arg0: i32) -> (i32, i32) {
    %c0_i32 = arith.constant 0 : i32
    %c0_i32_0 = arith.constant 0 : i32
    return %arg0, %c0_i32 : i32, i32
  }
  func.func @transform_2(%arg0: i32) -> (i32, i32) {
    %c0_i32 = arith.constant 0 : i32
    %c0_i32_0 = arith.constant 0 : i32
    %c0_i32_1 = arith.constant 0 : i32
    return %c0_i32, %c0_i32_0 : i32, i32
  }
  func.func @transform_3(%arg0: i32) -> (i32, i32) {
    %c0_i32 = arith.constant 0 : i32
    %c0_i32_0 = arith.constant 0 : i32
    %c0_i32_1 = arith.constant 0 : i32
    return %c0_i32, %c0_i32_0 : i32, i32
  }
  func.func @transform_4(%arg0: i32) -> (i32, i32) {
    %c0_i32 = arith.constant 0 : i32
    %c0_i32_0 = arith.constant 0 : i32
    %c0_i32_1 = arith.constant 0 : i32
    return %c0_i32, %c0_i32_0 : i32, i32
  }
  func.func @transform_5(%arg0: i32) -> (i32, i32) {
    %c0_i32 = arith.constant 0 : i32
    %c0_i32_0 = arith.constant 0 : i32
    %c0_i32_1 = arith.constant 0 : i32
    return %c0_i32, %c0_i32_0 : i32, i32
  }
  func.func @transform_6(%arg0: i32) -> (i32, i32) {
    %c0_i32 = arith.constant 0 : i32
    %c0_i32_0 = arith.constant 0 : i32
    %c0_i32_1 = arith.constant 0 : i32
    return %c0_i32, %c0_i32_0 : i32, i32
  }
  func.func @transform_7(%arg0: i32) -> (i32, i32) {
    %c0_i32 = arith.constant 0 : i32
    %c0_i32_0 = arith.constant 0 : i32
    %c0_i32_1 = arith.constant 0 : i32
    return %c0_i32, %c0_i32_0 : i32, i32
  }
  func.func @transform_8(%arg0: i32) -> (i32, i32) {
    %c0_i32 = arith.constant 0 : i32
    %c0_i32_0 = arith.constant 0 : i32
    %c0_i32_1 = arith.constant 0 : i32
    return %c0_i32, %c0_i32_0 : i32, i32
  }
  func.func @transform_9(%arg0: i32) -> (i32, i32) {
    %c0_i32 = arith.constant 0 : i32
    %c0_i32_0 = arith.constant 0 : i32
    %c0_i32_1 = arith.constant 0 : i32
    return %c0_i32, %c0_i32_0 : i32, i32
  }
  func.func @transform_10(%arg0: i32) -> (i32, i32) {
    %c0_i32 = arith.constant 0 : i32
    %c0_i32_0 = arith.constant 0 : i32
    %c0_i32_1 = arith.constant 0 : i32
    return %c0_i32, %c0_i32_0 : i32, i32
  }
  func.func @transform_11(%arg0: i32) -> (i32, i32) {
    %c0_i32 = arith.constant 0 : i32
    %c0_i32_0 = arith.constant 0 : i32
    %c0_i32_1 = arith.constant 0 : i32
    return %c0_i32, %c0_i32_0 : i32, i32
  }
  func.func @transform_12(%arg0: i32) -> (i32, i32) {
    %c0_i32 = arith.constant 0 : i32
    %c0_i32_0 = arith.constant 0 : i32
    %c0_i32_1 = arith.constant 0 : i32
    return %c0_i32, %c0_i32_0 : i32, i32
  }
  func.func @transform_13(%arg0: i32) -> (i32, i32) {
    %c0_i32 = arith.constant 0 : i32
    %c0_i32_0 = arith.constant 0 : i32
    %c0_i32_1 = arith.constant 0 : i32
    return %c0_i32, %c0_i32_0 : i32, i32
  }
  func.func @transform_14(%arg0: i32) -> (i32, i32) {
    %c0_i32 = arith.constant 0 : i32
    %c0_i32_0 = arith.constant 0 : i32
    %c0_i32_1 = arith.constant 0 : i32
    return %c0_i32, %c0_i32_0 : i32, i32
  }
  func.func @transform_15(%arg0: i32) -> (i32, i32) {
    %c0_i32 = arith.constant 0 : i32
    %c0_i32_0 = arith.constant 0 : i32
    return %arg0, %c0_i32 : i32, i32
  }
}

</mosaic_0001>

<bundles_post_ra>
// kernel: bert_encoder_4sentmix.3
= control target key start
LH: loop header
LB: loop body
LE: loop exit
PB: predicated region body
PF: predicated region fallthrough
CT: control target
= control target key end

     0   :  { %s2250_s18 = smov 0   ;;  %s2479_s0 = inlined_call_operand.vmem [shape: f32[16,32], index: 0, kind: input, shape index: {}]   ;;  %s2480_s1 = inlined_call_operand.vmem [shape: f32[16,8], index: 1, kind: input, shape index: {}]   ;;  %s2481_s2 = inlined_call_operand.vmem [shape: f32[1,32], index: 2, kind: input, shape index: {}]   ;;  %s2482_s3 = inlined_call_operand.vmem [shape: f32[32,96], index: 3, kind: input, shape index: {}]   ;;  %s2483_s4 = inlined_call_operand.vmem [shape: f32[1,96], index: 4, kind: input, shape index: {}]   ;;  %s2484_s5 = inlined_call_operand.vmem [shape: f32[32,32], index: 5, kind: input, shape index: {}]   ;;  %s2485_s6 = inlined_call_operand.vmem [shape: f32[1,32], index: 6, kind: input, shape index: {}]   ;;  %s2486_s7 = inlined_call_operand.vmem [shape: f32[1,32], index: 7, kind: input, shape index: {}]   ;;  %s2487_s8 = inlined_call_operand.vmem [shape: f32[1,32], index: 8, kind: input, shape index: {}]   ;;  %s2488_s9 = inlined_call_operand.vmem [shape: f32[32,64], index: 9, kind: input, shape index: {}]   ;;  %s2489_s10 = inlined_call_operand.vmem [shape: f32[1,64], index: 10, kind: input, shape index: {}]   ;;  %s2490_s11 = inlined_call_operand.vmem [shape: f32[64,32], index: 11, kind: input, shape index: {}]   ;;  %s2491_s12 = inlined_call_operand.vmem [shape: f32[1,32], index: 12, kind: input, shape index: {}]   ;;  %s2492_s13 = inlined_call_operand.vmem [shape: f32[1,32], index: 13, kind: input, shape index: {}]   ;;  %s2493_s14 = inlined_call_operand.vmem [shape: f32[1,32], index: 14, kind: input, shape index: {}]   ;;  %s2494_s15 = inlined_call_operand.vmem [shape: f32[16,32], index: 15, kind: output, shape index: {}]  }
   0x1 LB: > { %s1898_s19 = sadd.s32 4294967295, %s2154_s18   ;;  %p1902_p0 = scmp.ge.s32.totalorder %s2154_s18, 1  ;;  %s2154_s18 = sphi %s2250_s18, %s25_s18  }
   0x2   : > { %p445_p1 = scmp.lt.s32.totalorder %s2154_s18, 3 }
   0x4   : > { %p446_p2 = pnand %p1902_p0, %p445_p1 }
   0x5   : > { %v514_v0 = vld [vmem:[%s2482_s3] sm:$0xff] (!%p446_p2)  ;;  %v515_v1 = vld [vmem:[%s2482_s3 + $0x8] sm:$0xff] (!%p446_p2)  ;;  %v516_v2 = vld [vmem:[%s2482_s3 + $0x10] sm:$0xff] (!%p446_p2)  ;;  %v2156_v3 = vmov (!%p446_p2), 0.0|0.0   ;;  %vm2157_vm0 = vmmov (!%p446_p2), 0   ;;  %v2158_v6 = vmov (!%p446_p2), 0.0  }
   0x6   : > { %449 = sbr.rel (%p446_p2) target bundleno = 3993 (0xf99), region = 80  ;;  %2080 = vmatprep.subr.bf16.mxu0 (!%p446_p2), %v2156_v3  ;;  %v2081_v4 = vpack.c.bf16 (!%p446_p2), %v515_v1, %v514_v0  ;;  %v517_v5 = vld [vmem:[%s2482_s3 + $0x18] sm:$0xff] (!%p446_p2)  ;;  %1987 = vmatprep.mubr.msk.f32.mxu0 (!%p446_p2), %vm2157_vm0, %v2158_v6  ;;  %p495_p3 = scmp.lt.s32.totalorder (!%p446_p2), %s1898_s19, 1  ;;  %vm525_vm1 = vcmask (!%p446_p2), 261120   ;;  %v1906_v9 = vld [vmem:[%s2483_s4] ss:$0 sm:$0xff] (!%p446_p2) }
   0x7   : > { %1995 = vmatprep.subr.mxu1 (!%p446_p2), %v2158_v6  ;;  %1997 = vmatprep.mubr.msk.f32.mxu1 (!%p446_p2), %vm2157_vm0, %v2158_v6  ;;  %v2084_v7 = vpack.c.bf16 (!%p446_p2), %v517_v5, %v516_v2  ;;  %s2159_s20 = smov (!%p446_p2), 64   ;;  %s2160_s21 = smov (!%p446_p2), 96   ;;  %vm603_vm2 = vcmask (!%p446_p2), 64512   ;;  %v510_v31 = vld [vmem:[%s2484_s5] sm:$0xff] (!%p446_p2)  ;;  %v511_v61 = vld [vmem:[%s2484_s5 + $0x8] sm:$0xff] (!%p446_p2)  ;;  %vm1728_vm3 = vcmask (!%p446_p2), 523264  }
   0x8   : > { %2082 = vmatpush3.bf16.msra.mxu0 (!%p446_p2), %v2081_v4  ;;  %s2161_s22 = smov (!%p446_p2), 88   ;;  %s2162_s26 = smov (!%p446_p2), 56   ;;  %v2333_v32 = vld [vmem:[%s2481_s2] ss:$0 sm:$0xff] (!%p446_p2) }
   0x9   : > { %2083 = vmatprep.subr.bf16.mxu0 (!%p446_p2), %v2156_v3  ;;  %s2163_s27 = smov (!%p446_p2), 80   ;;  %s2164_s29 = smov (!%p446_p2), 120  }
   0xa   : > { %s2166_s23 = smov (!%p446_p2), 48   ;;  %s2167_s24 = smov (!%p446_p2), 72  }
   0xc   : > { %2085 = vmatpush3.bf16.msra.mxu0 (!%p446_p2), %v2084_v7 }
   0xd   : > { %s2496_s19 = smov (!%p495_p3, %s1898_s19), 1  ;;  %1990 = vmatprep.subr.mxu0 %v2158_v6 }
   0xe   : > { %s2277_s28 = sshll.u32 %s2496_s19, 3 }
   0xf   : > { %s498_s16 = scalar_lea.vmem %s2479_s0, %s2277_s28  ;;  %s502_s25 = scalar_lea.vmem %s2480_s1, %s2277_s28 }
  0x10   : > { %v2283_v8 = vld [vmem:[%s498_s16] sm:$0xff]  ;;  %s2169_s16 = smov 40   ;;  %s506_s19 = scalar_lea.vmem %s2494_s15, %s2277_s28 }
  0x11   : > { %1988 = vmatmul.mubr.msk.f32.vlgmr.msra.gmra.mrb[0].mxu0 %vm525_vm1, %v2283_v8  ;;  %v2309_v16 = vld [vmem:[%s502_s25] sm:$0xff]  ;;  %s2168_s25 = smov 104  }
  0x12   : > { %1992 = vmatprep.mubr.msk.f32.mxu0 %vm2157_vm0, %v2158_v6 }
  0xe4   : > { %v595_v10 = vpop.f32.mrb[0].mxu0 }
  0xe5   : > { %v2293_v11 = vadd.f32 %v1906_v9, %v595_v10  ;;  %v1989_v12 = vpop.f32.mrb[1].mxu0 }
  0xe7   : > { %691 = vrot.lane.b32.xlu1 %v2293_v11, %s2159_s20  ;;  %601 = vrot.lane.b32.xlu0 %v2293_v11, %s2160_s21  ;;  %s2165_s20 = smov 112  }
  0xeb   : > { %856 = vrot.lane.b32.xlu1 %v2293_v11, %s2161_s22 }
 0x159   : > { %v692_v13 = vpop.permute.xlu1 %691  ;;  %v602_v14 = vpop.permute.xlu0 %601 }
 0x15a   : > { %1991 = vmatpush3.xpose.msk.msra.mxu0 %vm603_vm2, %v602_v14  ;;  %1996 = vmatpush3.msra.mxu1 %v692_v13 }
 0x15b   : > { %2005 = vmatprep.subr.mxu1 %v2158_v6  ;;  %2000 = vmatprep.subr.mxu0 %v2158_v6 }
 0x15d   : > { %1993 = vmatmul.mubr.msk.f32.vlgmr.msra.gmra.mrb[2].mxu0 %vm603_vm2, %v2293_v11  ;;  %v857_v26 = vpop.permute.xlu1 %856 }
 0x15e   : > { %2002 = vmatprep.mubr.msk.f32.mxu0 %vm2157_vm0, %v2158_v6  ;;  %2001 = vmatpush3.msra.mxu0 %v510_v31 }
 0x15f   : > { %2010 = vmatprep.subr.mxu0 %v2158_v6 }
 0x230   : > { %v674_v15 = vpop.f32.mrb[2].mxu0 }
 0x231   : > { %v678_v17 = vmul.f32 0.35355338, %v674_v15  ;;  %v1994_v18 = vpop.f32.mrb[3].mxu0  ;;  %v1913_v15 = vld [vmem:[%s2485_s6] ss:$0 sm:$0xff] }
 0x233   : > { %v679_v19 = vadd.f32 %v678_v17, %v2309_v16 }
 0x235   : > { %v680_v20 = vsel %vm603_vm2, %v679_v19, -inf }
 0x236   : > { %681 = vmax.xlane.f32.xlu0 %v680_v20 }
 0x24c   : > { %945 = vrot.lane.b32.xlu0 %v2293_v11, %s2162_s26 }
 0x250   : > { %1101 = vrot.lane.b32.xlu0 %v2293_v11, %s2163_s27 }
 0x2c3   : > { %v682_v21 = vpop.xlane.xlu0 %681 }
 0x2c4   : > { %v683_v22 = vsub.f32 %v679_v19, %v682_v21  ;;  %v512_v21 = vld [vmem:[%s2484_s5 + $0x10] sm:$0xff] }
 0x2c6   : > { %v684_v23 = vmul.f32 1.442695, %v683_v22 }
 0x2c7   : > { %v946_v36 = vpop.permute.xlu0 %945 }
 0x2c8   : > { %2126 = vpow2.f32 %v684_v23 }
 0x2cb   : > { %v1102_v49 = vpop.permute.xlu0 %1101 }
 0x2d2   : > { %v2127_v24 = vpop.eup %2126 }
 0x2d3   : > { %v686_v25 = vsel %vm603_vm2, %v2127_v24, 0.0 }
 0x2d4   : > { %687 = vadd.xlane.f32.xlu1 %v686_v25 }
 0x2e5   : > { %854 = vrot.lane.b32.xlu1 %v2293_v11, %s2164_s29 }
 0x361   : > { %v688_v27 = vpop.xlane.xlu1 %687 }
 0x362   : > { %2128 = vrcp.f32 %v688_v27 }
 0x365   : > { %v855_v30 = vpop.permute.xlu1 %854 }
 0x36c   : > { %v2129_v28 = vpop.eup %2128 }
 0x36d   : > { %v690_v29 = vmul.f32 %v2129_v28, %v2127_v24 }
 0x36f   : > { %1998 = vmatmul.mubr.msk.f32.vlgmr.msra.gmra.mrb[0].mxu1 %vm603_vm2, %v690_v29 }
 0x370   : > { %2006 = vmatpush3.xpose.msk.msra.mxu1 %vm603_vm2, %v857_v26  ;;  %2007 = vmatprep.mubr.msk.f32.mxu1 %vm2157_vm0, %v2158_v6 }
 0x371   : > { %2015 = vmatprep.subr.mxu1 %v2158_v6 }
 0x373   : > { %2008 = vmatmul.mubr.msk.f32.vlgmr.msra.gmra.mrb[2].mxu1 %vm603_vm2, %v855_v30 }
 0x374   : > { %2017 = vmatprep.mubr.msk.f32.mxu1 %vm2157_vm0, %v2158_v6  ;;  %2016 = vmatpush3.msra.mxu1 %v511_v61 }
 0x375   : > { %2025 = vmatprep.subr.mxu1 %v2158_v6 }
 0x442   : > { %v763_v33 = vpop.f32.mrb[0].mxu1 }
 0x443   : > { %v773_v34 = vmul.f32 %v2333_v32, %v763_v33  ;;  %v1999_v35 = vpop.f32.mrb[1].mxu1 }
 0x445   : > { %2003 = vmatmul.mubr.msk.f32.vlgmr.msra.gmra.mrb[4].mxu0 %vm603_vm2, %v773_v34 }
 0x446   : > { %2011 = vmatpush3.msra.mxu0 %v946_v36  ;;  %v928_v37 = vpop.f32.mrb[2].mxu1  ;;  %2012 = vmatprep.mubr.msk.f32.mxu0 %vm2157_vm0, %v2158_v6 }
 0x447   : > { %v932_v38 = vmul.f32 0.35355338, %v928_v37  ;;  %v2009_v39 = vpop.f32.mrb[3].mxu1  ;;  %2020 = vmatprep.subr.mxu0 %v2158_v6 }
 0x449   : > { %v933_v40 = vadd.f32 %v932_v38, %v2309_v16 }
 0x44b   : > { %v934_v41 = vsel %vm603_vm2, %v933_v40, -inf }
 0x44c   : > { %935 = vmax.xlane.f32.xlu1 %v934_v41 }
 0x4d9   : > { %v936_v42 = vpop.xlane.xlu1 %935 }
 0x4da   : > { %v937_v43 = vsub.f32 %v933_v40, %v936_v42 }
 0x4dc   : > { %v938_v44 = vmul.f32 1.442695, %v937_v43 }
 0x4de   : > { %2130 = vpow2.f32 %v938_v44 }
 0x4e8   : > { %v2131_v45 = vpop.eup %2130 }
 0x4e9   : > { %v940_v46 = vsel %vm603_vm2, %v2131_v45, 0.0 }
 0x4ea   : > { %941 = vadd.xlane.f32.xlu0 %v940_v46 }
 0x500   : > { %1099 = vrot.lane.b32.xlu0 %v2293_v11, %s2165_s20 }
 0x518   : > { %v843_v47 = vpop.f32.mrb[4].mxu0 }
 0x519   : > { %v2004_v48 = vpop.f32.mrb[5].mxu0  ;;  %v853_v17 = vadd.f32 %v1913_v15, %v843_v47  ;;  %v1717_v15 = vld [vmem:[%s2490_s11 + $0x20] sm:$0xff] }
 0x577   : > { %v942_v50 = vpop.xlane.xlu0 %941 }
 0x578   : > { %2132 = vrcp.f32 %v942_v50 }
 0x57b   : > { %v1100_v53 = vpop.permute.xlu0 %1099 }
 0x582   : > { %v2133_v51 = vpop.eup %2132 }
 0x583   : > { %v944_v52 = vmul.f32 %v2133_v51, %v2131_v45 }
 0x585   : > { %2013 = vmatmul.mubr.msk.f32.vlgmr.msra.gmra.mrb[6].mxu0 %vm603_vm2, %v944_v52 }
 0x586   : > { %2021 = vmatpush3.xpose.msk.msra.mxu0 %vm603_vm2, %v1102_v49  ;;  %2022 = vmatprep.mubr.msk.f32.mxu0 %vm2157_vm0, %v2158_v6 }
 0x587   : > { %2030 = vmatprep.subr.mxu0 %v2158_v6 }
 0x589   : > { %2023 = vmatmul.mubr.msk.f32.vlgmr.msra.gmra.mrb[8].mxu0 %vm603_vm2, %v1100_v53 }
 0x58a   : > { %2032 = vmatprep.mubr.msk.f32.mxu0 %vm2157_vm0, %v2158_v6  ;;  %2031 = vmatpush3.msra.mxu0 %v512_v21 }
 0x58b   : > { %2040 = vmatprep.subr.mxu0 %v2158_v6 }
 0x658   : > { %v1017_v54 = vpop.f32.mrb[6].mxu0 }
 0x659   : > { %v2014_v55 = vpop.f32.mrb[7].mxu0 }
 0x65c   : > { %v1173_v56 = vpop.f32.mrb[8].mxu0 }
 0x65d   : > { %v1177_v57 = vmul.f32 0.35355338, %v1173_v56  ;;  %v2024_v58 = vpop.f32.mrb[9].mxu0  ;;  %v1620_v56 = vld [vmem:[%s2488_s9] sm:$0xff] }
 0x65e   : > { %v1623_v58 = vld [vmem:[%s2488_s9 + $0x18] sm:$0xff] }
 0x65f   : > { %v1178_v59 = vadd.f32 %v1177_v57, %v2309_v16 }
 0x661   : > { %v1179_v60 = vsel %vm603_vm2, %v1178_v59, -inf }
 0x662   : > { %1180 = vmax.xlane.f32.xlu1 %v1179_v60 }
 0x673   : > { %1021 = vrot.lane.b32.xlu1 %v2333_v32, %s2164_s29 }
 0x677   : > { %1190 = vrot.lane.b32.xlu1 %v2293_v11, %s2166_s23 }
 0x67b   : > { %1346 = vrot.lane.b32.xlu1 %v2293_v11, %s2167_s24 }
 0x67f   : > { %1344 = vrot.lane.b32.xlu1 %v2293_v11, %s2168_s25 }
 0x6ef   : > { %v1181_v62 = vpop.xlane.xlu1 %1180 }
 0x6f0   : > { %v1182_v63 = vsub.f32 %v1178_v59, %v1181_v62 }
 0x6f2   : > { %v1183_v0 = vmul.f32 1.442695, %v1182_v63 }
 0x6f3   : > { %v1022_v1 = vpop.permute.xlu1 %1021 }
 0x6f4   : > { %2134 = vpow2.f32 %v1183_v0  ;;  %v1024_v2 = vmul.f32 %v1022_v1, %v1017_v54  ;;  %v1926_v0 = vld [vmem:[%s2486_s7] ss:$0 sm:$0xff] }
 0x6f6   : > { %2018 = vmatmul.mubr.msk.f32.vlgmr.msra.gmra.mrb[4].mxu1 %vm603_vm2, %v1024_v2  ;;  %v1927_v2 = vld [vmem:[%s2487_s8] ss:$0 sm:$0xff] }
 0x6f7   : > { %v1191_v4 = vpop.permute.xlu1 %1190  ;;  %2027 = vmatprep.mubr.msk.f32.mxu1 %vm2157_vm0, %v2158_v6 }
 0x6f8   : > { %2026 = vmatpush3.msra.mxu1 %v1191_v4 }
 0x6f9   : > { %2035 = vmatprep.subr.mxu1 %v2158_v6 }
 0x6fb   : > { %v1347_v12 = vpop.permute.xlu1 %1346 }
 0x6fe   : > { %v2135_v5 = vpop.eup %2134 }
 0x6ff   : > { %v1185_v7 = vsel %vm603_vm2, %v2135_v5, 0.0  ;;  %v1345_v14 = vpop.permute.xlu1 %1344 }
 0x700   : > { %1186 = vadd.xlane.f32.xlu0 %v1185_v7  ;;  %v1713_v7 = vld [vmem:[%s2490_s11] sm:$0xff] }
 0x716   : > { %1266 = vrot.lane.b32.xlu0 %v2333_v32, %s2165_s20 }
 0x78d   : > { %v1187_v9 = vpop.xlane.xlu0 %1186 }
 0x78e   : > { %2136 = vrcp.f32 %v1187_v9  ;;  %v1714_v9 = vld [vmem:[%s2490_s11 + $0x8] sm:$0xff] }
 0x791   : > { %v1267_v22 = vpop.permute.xlu0 %1266 }
 0x798   : > { %v2137_v10 = vpop.eup %2136 }
 0x799   : > { %v1189_v13 = vmul.f32 %v2137_v10, %v2135_v5  ;;  %v2093_v10 = vpack.c.bf16 %v1714_v9, %v1713_v7 }
 0x79b   : > { %2028 = vmatmul.mubr.msk.f32.vlgmr.msra.gmra.mrb[6].mxu1 %vm603_vm2, %v1189_v13  ;;  %v1716_v13 = vld [vmem:[%s2490_s11 + $0x18] sm:$0xff] }
 0x79c   : > { %2036 = vmatpush3.xpose.msk.msra.mxu1 %vm603_vm2, %v1347_v12  ;;  %2037 = vmatprep.mubr.msk.f32.mxu1 %vm2157_vm0, %v2158_v6  ;;  %v1715_v12 = vld [vmem:[%s2490_s11 + $0x10] sm:$0xff] }
 0x79d   : > { %2045 = vmatprep.subr.mxu1 %v2158_v6 }
 0x79f   : > { %2038 = vmatmul.mubr.msk.f32.vlgmr.msra.gmra.mrb[8].mxu1 %vm603_vm2, %v1345_v14  ;;  %v2096_v14 = vpack.c.bf16 %v1716_v13, %v1715_v12 }
 0x7a0   : > { %2047 = vmatprep.mubr.msk.f32.mxu1 %vm2157_vm0, %v2158_v6 }
 0x7c9   : > { %v1094_v18 = vpop.f32.mrb[4].mxu1 }
 0x7ca   : > { %v1098_v19 = vadd.f32 %v1094_v18, %v853_v17  ;;  %v2019_v20 = vpop.f32.mrb[5].mxu1  ;;  %v1718_v17 = vld [vmem:[%s2490_s11 + $0x28] sm:$0xff] }
 0x7cb   : > { %v2099_v18 = vpack.c.bf16 %v1718_v17, %v1717_v15  ;;  %v1720_v20 = vld [vmem:[%s2490_s11 + $0x38] sm:$0xff] }
 0x86e   : > { %v1262_v23 = vpop.f32.mrb[6].mxu1 }
 0x86f   : > { %v1269_v24 = vmul.f32 %v1267_v22, %v1262_v23  ;;  %v2029_v25 = vpop.f32.mrb[7].mxu1  ;;  %v1928_v22 = vld [vmem:[%s2489_s10] ss:$0 sm:$0xff] }
 0x871   : > { %2033 = vmatmul.mubr.msk.f32.vlgmr.msra.gmra.mrb[10].mxu0 %vm603_vm2, %v1269_v24 }
 0x872   : > { %v1418_v26 = vpop.f32.mrb[8].mxu1  ;;  %2042 = vmatprep.mubr.msk.f32.mxu0 %vm2157_vm0, %v2158_v6 }
 0x873   : > { %v1422_v27 = vmul.f32 0.35355338, %v1418_v26  ;;  %v2039_v28 = vpop.f32.mrb[9].mxu1 }
 0x875   : > { %v1423_v29 = vadd.f32 %v1422_v27, %v2309_v16  ;;  %v513_v16 = vld [vmem:[%s2484_s5 + $0x18] sm:$0xff] }
 0x876   : > { %2046 = vmatpush3.msra.mxu1 %v513_v16 }
 0x877   : > { %v1424_v30 = vsel %vm603_vm2, %v1423_v29, -inf  ;;  %2092 = vmatprep.subr.bf16.mxu1 %v2156_v3 }
 0x878   : > { %1425 = vmax.xlane.f32.xlu1 %v1424_v30 }
 0x905   : > { %v1426_v31 = vpop.xlane.xlu1 %1425 }
 0x906   : > { %v1427_v33 = vsub.f32 %v1423_v29, %v1426_v31 }
 0x908   : > { %v1428_v34 = vmul.f32 1.442695, %v1427_v33 }
 0x90a   : > { %2138 = vpow2.f32 %v1428_v34 }
 0x914   : > { %v2139_v35 = vpop.eup %2138 }
 0x915   : > { %v1430_v36 = vsel %vm603_vm2, %v2139_v35, 0.0 }
 0x916   : > { %1431 = vadd.xlane.f32.xlu0 %v1430_v36 }
 0x92c   : > { %1435 = vrot.lane.b32.xlu0 %v2293_v11, %s2169_s16 }
 0x930   : > { %1511 = vrot.lane.b32.xlu0 %v2333_v32, %s2168_s25 }
 0x944   : > { %v1339_v37 = vpop.f32.mrb[10].mxu0 }
 0x945   : > { %v1343_v38 = vadd.f32 %v1339_v37, %v1098_v19  ;;  %v2034_v39 = vpop.f32.mrb[11].mxu0  ;;  %v1719_v19 = vld [vmem:[%s2490_s11 + $0x30] sm:$0xff] }
 0x946   : > { %v2102_v21 = vpack.c.bf16 %v1720_v20, %v1719_v19 }
 0x9a3   : > { %v1432_v40 = vpop.xlane.xlu0 %1431 }
 0x9a4   : > { %2140 = vrcp.f32 %v1432_v40 }
 0x9a7   : > { %v1436_v41 = vpop.permute.xlu0 %1435 }
 0x9a8   : > { %2041 = vmatpush3.msra.mxu0 %v1436_v41 }
 0x9a9   : > { %2086 = vmatprep.subr.bf16.mxu0 %v2156_v3 }
 0x9ab   : > { %v1512_v32 = vpop.permute.xlu0 %1511 }
 0x9ae   : > { %v2141_v11 = vpop.eup %2140 }
 0x9af   : > { %v1434_v42 = vmul.f32 %v2141_v11, %v2139_v35 }
 0x9b1   : > { %2043 = vmatmul.mubr.msk.f32.vlgmr.msra.gmra.mrb[12].mxu0 %vm603_vm2, %v1434_v42 }
 0x9b2   : > { %2058 = vmatprep.mubr.msk.f32.mxu0 %vm2157_vm0, %v2158_v6 }
 0xa84   : > { %v1507_v43 = vpop.f32.mrb[12].mxu0 }
 0xa85   : > { %v1514_v44 = vmul.f32 %v1512_v32, %v1507_v43  ;;  %v2044_v45 = vpop.f32.mrb[13].mxu0 }
 0xa87   : > { %2048 = vmatmul.mubr.msk.f32.vlgmr.msra.gmra.mrb[10].mxu1 %vm603_vm2, %v1514_v44 }
 0xa88   : > { %2077 = vmatprep.mubr.msk.f32.mxu1 %vm2157_vm0, %v2158_v6  ;;  %v1621_v6 = vld [vmem:[%s2488_s9 + $0x8] sm:$0xff]  ;;  %2094 = vmatpush3.bf16.msra.mxu1 %v2093_v10 }
 0xa89   : > { %v2087_v57 = vpack.c.bf16 %v1621_v6, %v1620_v56  ;;  %2095 = vmatprep.subr.bf16.mxu1 %v2156_v3 }
 0xa8b   : > { %2088 = vmatpush3.bf16.msra.mxu0 %v2087_v57 }
 0xa8c   : > { %2089 = vmatprep.subr.bf16.mxu0 %v2156_v3  ;;  %2097 = vmatpush3.bf16.msra.mxu1 %v2096_v14 }
 0xa8d   : > { %2098 = vmatprep.subr.bf16.mxu1 %v2156_v3 }
 0xa90   : > { %2100 = vmatpush3.bf16.msra.mxu1 %v2099_v18 }
 0xa91   : > { %2101 = vmatprep.subr.bf16.mxu1 %v2156_v3  ;;  %v1930_v3 = vld [vmem:[%s2491_s12] ss:$0 sm:$0xff] }
 0xa94   : > { %2103 = vmatpush3.bf16.msra.mxu1 %v2102_v21 }
 0xb5a   : > { %v1584_v46 = vpop.f32.mrb[10].mxu1 }
 0xb5b   : > { %v1588_v47 = vadd.f32 %v1584_v46, %v1343_v38  ;;  %v2049_v48 = vpop.f32.mrb[11].mxu1 }
 0xb5d   : > { %v1589_v49 = vadd.f32 %v1588_v47, %v2283_v8  ;;  %v1622_v8 = vld [vmem:[%s2488_s9 + $0x10] sm:$0xff]  ;;  %v1932_v47 = vld [vmem:[%s2492_s13] ss:$0 sm:$0xff] }
 0xb5e   : > { %v2090_v59 = vpack.c.bf16 %v1623_v58, %v1622_v8 }
 0xb5f   : > { %v1592_v50 = vsel %vm525_vm1, %v1589_v49, 0.0 }
 0xb60   : > { %1593 = vadd.xlane.f32.xlu0 %v1592_v50  ;;  %2091 = vmatpush3.bf16.msra.mxu0 %v2090_v59 }
 0xbed   : > { %v1594_v51 = vpop.xlane.xlu0 %1593 }
 0xbee   : > { %v1596_v52 = vmul.f32 0.03125, %v1594_v51 }
 0xbf0   : > { %v1597_v53 = vsub.f32 %v1589_v49, %v1596_v52  ;;  %v1933_v49 = vld [vmem:[%s2493_s14] ss:$0 sm:$0xff] }
 0xbf2   : > { %v1598_v54 = vmul.f32 %v1597_v53, %v1597_v53 }
 0xbf4   : > { %v1599_v55 = vsel %vm525_vm1, %v1598_v54, 0.0 }
 0xbf5   : > { %1600 = vadd.xlane.f32.xlu1 %v1599_v55 }
 0xc82   : > { %v1601_v60 = vpop.xlane.xlu1 %1600 }
 0xc83   : > { %v1602_v61 = vmul.f32 0.03125, %v1601_v60 }
 0xc85   : > { %v1603_v62 = vadd.f32 1e-12, %v1602_v61 }
 0xc87   : > { %2142 = vrsqrt.f32 %v1603_v62 }
 0xc91   : > { %v2143_v63 = vpop.eup %2142 }
 0xc92   : > { %v1605_v1 = vmul.f32 %v2143_v63, %v1597_v53 }
 0xc94   : > { %v1612_v4 = vmul.f32 %v1926_v0, %v1605_v1 }
 0xc96   : > { %v1619_v5 = vadd.f32 %v1927_v2, %v1612_v4 }
 0xc98   : > { %2059 = vmatmul.mubr.msk.f32.vlgmr.msra.gmra.mrb[14].mxu0 %vm525_vm1, %v1619_v5 }
 0xd6b   : > { %v1700_v23 = vpop.f32.mrb[14].mxu0 }
 0xd6c   : > { %v1701_v24 = vadd.f32 %v1928_v22, %v1700_v23  ;;  %v2060_v25 = vpop.f32.mrb[15].mxu0 }
 0xd6e   : > { %v1705_v26 = vmul.f32 0.044715, %v1701_v24  ;;  %v1704_v33 = vmul.f32 0.5, %v1701_v24 }
 0xd70   : > { %v1706_v27 = vmul.f32 %v1705_v26, %v1701_v24 }
 0xd72   : > { %v1707_v28 = vmul.f32 %v1706_v27, %v1701_v24 }
 0xd74   : > { %v1708_v29 = vadd.f32 %v1707_v28, %v1701_v24 }
 0xd76   : > { %v1709_v30 = vmul.f32 0.7978846, %v1708_v29 }
 0xd78   : > { %2144 = vtanh.f32 %v1709_v30 }
 0xd82   : > { %v2145_v31 = vpop.eup %2144 }
 0xd83   : > { %v1711_v34 = vadd.f32 1.0, %v2145_v31 }
 0xd85   : > { %v1712_v35 = vmul.f32 %v1711_v34, %v1704_v33 }
 0xd87   : > { %2078 = vmatmul.mubr.msk.f32.vlgmr.msra.gmra.mrb[12].mxu1 %vm1728_vm3, %v1712_v35 }
 0xe5a   : > { %v1798_v36 = vpop.f32.mrb[12].mxu1 }
 0xe5b   : > { %v1799_v16 = vadd.f32 %v1930_v3, %v1798_v36  ;;  %v2079_v37 = vpop.f32.mrb[13].mxu1 }
 0xe5d   : > { %v1802_v38 = vadd.f32 %v1799_v16, %v1619_v5 }
 0xe5f   : > { %v1805_v39 = vsel %vm525_vm1, %v1802_v38, 0.0 }
 0xe60   : > { %1806 = vadd.xlane.f32.xlu1 %v1805_v39 }
 0xeed   : > { %v1807_v40 = vpop.xlane.xlu1 %1806 }
 0xeee   : > { %v1808_v41 = vmul.f32 0.03125, %v1807_v40 }
 0xef0   : > { %v1809_v11 = vsub.f32 %v1802_v38, %v1808_v41 }
 0xef2   : > { %v1810_v42 = vmul.f32 %v1809_v11, %v1809_v11 }
 0xef4   : > { %v1811_v32 = vsel %vm525_vm1, %v1810_v42, 0.0 }
 0xef5   : > { %1812 = vadd.xlane.f32.xlu1 %v1811_v32 }
 0xf82   : > { %v1813_v43 = vpop.xlane.xlu1 %1812 }
 0xf83   : > { %v1814_v44 = vmul.f32 0.03125, %v1813_v43 }
 0xf85   : > { %v1815_v45 = vadd.f32 1e-12, %v1814_v44 }
 0xf87   : > { %2146 = vrsqrt.f32 %v1815_v45 }
 0xf91   : > { %v2147_v46 = vpop.eup %2146 }
 0xf92   : > { %v1817_v48 = vmul.f32 %v2147_v46, %v1809_v11 }
 0xf94   : > { %v1824_v50 = vmul.f32 %v1932_v47, %v1817_v48 }
 0xf96   : > { %v1831_v51 = vadd.f32 %v1933_v49, %v1824_v50 }
 0xf98   : > { %1832 = vst.msk [vmem:[%s506_s19] sm:$0xff] %vm525_vm1, %v1831_v51 }
 0xf99 PF: > { %s25_s18 = sadd.s32 1, %s2154_s18  }
 0xf9a   : > { %p22_p4 = scmp.ge.s32.totalorder %s25_s18, 4  }
 0xf9c   :  { %24 = sbr.rel (!%p22_p4) target bundleno = 1 (0x1), region = 113 }

// kernel: bert_encoder_4sentmix.2
= control target key start
LH: loop header
LB: loop body
LE: loop exit
PB: predicated region body
PF: predicated region fallthrough
CT: control target
= control target key end

     0   :  { %s2250_s18 = smov 0   ;;  %s2479_s0 = inlined_call_operand.vmem [shape: f32[32,32], index: 0, kind: input, shape index: {}]   ;;  %s2480_s1 = inlined_call_operand.vmem [shape: f32[32,8], index: 1, kind: input, shape index: {}]   ;;  %s2481_s2 = inlined_call_operand.vmem [shape: f32[1,32], index: 2, kind: input, shape index: {}]   ;;  %s2482_s3 = inlined_call_operand.vmem [shape: f32[32,96], index: 3, kind: input, shape index: {}]   ;;  %s2483_s4 = inlined_call_operand.vmem [shape: f32[1,96], index: 4, kind: input, shape index: {}]   ;;  %s2484_s5 = inlined_call_operand.vmem [shape: f32[32,32], index: 5, kind: input, shape index: {}]   ;;  %s2485_s6 = inlined_call_operand.vmem [shape: f32[1,32], index: 6, kind: input, shape index: {}]   ;;  %s2486_s7 = inlined_call_operand.vmem [shape: f32[1,32], index: 7, kind: input, shape index: {}]   ;;  %s2487_s8 = inlined_call_operand.vmem [shape: f32[1,32], index: 8, kind: input, shape index: {}]   ;;  %s2488_s9 = inlined_call_operand.vmem [shape: f32[32,64], index: 9, kind: input, shape index: {}]   ;;  %s2489_s10 = inlined_call_operand.vmem [shape: f32[1,64], index: 10, kind: input, shape index: {}]   ;;  %s2490_s11 = inlined_call_operand.vmem [shape: f32[64,32], index: 11, kind: input, shape index: {}]   ;;  %s2491_s12 = inlined_call_operand.vmem [shape: f32[1,32], index: 12, kind: input, shape index: {}]   ;;  %s2492_s13 = inlined_call_operand.vmem [shape: f32[1,32], index: 13, kind: input, shape index: {}]   ;;  %s2493_s14 = inlined_call_operand.vmem [shape: f32[1,32], index: 14, kind: input, shape index: {}]   ;;  %s2494_s15 = inlined_call_operand.vmem [shape: f32[32,32], index: 15, kind: output, shape index: {}]  }
   0x1 LB: > { %s1898_s19 = sadd.s32 4294967295, %s2154_s18   ;;  %p1902_p0 = scmp.ge.s32.totalorder %s2154_s18, 1  ;;  %s2154_s18 = sphi %s2250_s18, %s25_s18  }
   0x2   : > { %p445_p1 = scmp.lt.s32.totalorder %s2154_s18, 5 }
   0x4   : > { %p446_p2 = pnand %p1902_p0, %p445_p1 }
   0x5   : > { %v514_v0 = vld [vmem:[%s2482_s3] sm:$0xff] (!%p446_p2)  ;;  %v515_v1 = vld [vmem:[%s2482_s3 + $0x8] sm:$0xff] (!%p446_p2)  ;;  %v516_v2 = vld [vmem:[%s2482_s3 + $0x10] sm:$0xff] (!%p446_p2)  ;;  %v2156_v3 = vmov (!%p446_p2), 0.0|0.0   ;;  %vm2157_vm0 = vmmov (!%p446_p2), 0   ;;  %v2158_v6 = vmov (!%p446_p2), 0.0  }
   0x6   : > { %449 = sbr.rel (%p446_p2) target bundleno = 3993 (0xf99), region = 80  ;;  %2080 = vmatprep.subr.bf16.mxu0 (!%p446_p2), %v2156_v3  ;;  %v2081_v4 = vpack.c.bf16 (!%p446_p2), %v515_v1, %v514_v0  ;;  %v517_v5 = vld [vmem:[%s2482_s3 + $0x18] sm:$0xff] (!%p446_p2)  ;;  %1987 = vmatprep.mubr.msk.f32.mxu0 (!%p446_p2), %vm2157_vm0, %v2158_v6  ;;  %p495_p3 = scmp.lt.s32.totalorder (!%p446_p2), %s1898_s19, 3  ;;  %vm525_vm1 = vcmask (!%p446_p2), 261120   ;;  %v1906_v9 = vld [vmem:[%s2483_s4] ss:$0 sm:$0xff] (!%p446_p2) }
   0x7   : > { %1995 = vmatprep.subr.mxu1 (!%p446_p2), %v2158_v6  ;;  %1997 = vmatprep.mubr.msk.f32.mxu1 (!%p446_p2), %vm2157_vm0, %v2158_v6  ;;  %v2084_v7 = vpack.c.bf16 (!%p446_p2), %v517_v5, %v516_v2  ;;  %s2159_s20 = smov (!%p446_p2), 64   ;;  %s2160_s21 = smov (!%p446_p2), 96   ;;  %vm603_vm2 = vcmask (!%p446_p2), 64512   ;;  %v510_v31 = vld [vmem:[%s2484_s5] sm:$0xff] (!%p446_p2)  ;;  %v511_v61 = vld [vmem:[%s2484_s5 + $0x8] sm:$0xff] (!%p446_p2)  ;;  %vm1728_vm3 = vcmask (!%p446_p2), 523264  }
   0x8   : > { %2082 = vmatpush3.bf16.msra.mxu0 (!%p446_p2), %v2081_v4  ;;  %s2161_s22 = smov (!%p446_p2), 88   ;;  %s2162_s26 = smov (!%p446_p2), 56   ;;  %v2333_v32 = vld [vmem:[%s2481_s2] ss:$0 sm:$0xff] (!%p446_p2) }
   0x9   : > { %2083 = vmatprep.subr.bf16.mxu0 (!%p446_p2), %v2156_v3  ;;  %s2163_s27 = smov (!%p446_p2), 80   ;;  %s2164_s29 = smov (!%p446_p2), 120  }
   0xa   : > { %s2166_s23 = smov (!%p446_p2), 48   ;;  %s2167_s24 = smov (!%p446_p2), 72  }
   0xc   : > { %2085 = vmatpush3.bf16.msra.mxu0 (!%p446_p2), %v2084_v7 }
   0xd   : > { %s2496_s19 = smov (!%p495_p3, %s1898_s19), 3  ;;  %1990 = vmatprep.subr.mxu0 %v2158_v6 }
   0xe   : > { %s2277_s28 = sshll.u32 %s2496_s19, 3 }
   0xf   : > { %s498_s16 = scalar_lea.vmem %s2479_s0, %s2277_s28  ;;  %s502_s25 = scalar_lea.vmem %s2480_s1, %s2277_s28 }
  0x10   : > { %v2283_v8 = vld [vmem:[%s498_s16] sm:$0xff]  ;;  %s2169_s16 = smov 40   ;;  %s506_s19 = scalar_lea.vmem %s2494_s15, %s2277_s28 }
  0x11   : > { %1988 = vmatmul.mubr.msk.f32.vlgmr.msra.gmra.mrb[0].mxu0 %vm525_vm1, %v2283_v8  ;;  %v2309_v16 = vld [vmem:[%s502_s25] sm:$0xff]  ;;  %s2168_s25 = smov 104  }
  0x12   : > { %1992 = vmatprep.mubr.msk.f32.mxu0 %vm2157_vm0, %v2158_v6 }
  0xe4   : > { %v595_v10 = vpop.f32.mrb[0].mxu0 }
  0xe5   : > { %v2293_v11 = vadd.f32 %v1906_v9, %v595_v10  ;;  %v1989_v12 = vpop.f32.mrb[1].mxu0 }
  0xe7   : > { %691 = vrot.lane.b32.xlu1 %v2293_v11, %s2159_s20  ;;  %601 = vrot.lane.b32.xlu0 %v2293_v11, %s2160_s21  ;;  %s2165_s20 = smov 112  }
  0xeb   : > { %856 = vrot.lane.b32.xlu1 %v2293_v11, %s2161_s22 }
 0x159   : > { %v692_v13 = vpop.permute.xlu1 %691  ;;  %v602_v14 = vpop.permute.xlu0 %601 }
 0x15a   : > { %1991 = vmatpush3.xpose.msk.msra.mxu0 %vm603_vm2, %v602_v14  ;;  %1996 = vmatpush3.msra.mxu1 %v692_v13 }
 0x15b   : > { %2005 = vmatprep.subr.mxu1 %v2158_v6  ;;  %2000 = vmatprep.subr.mxu0 %v2158_v6 }
 0x15d   : > { %1993 = vmatmul.mubr.msk.f32.vlgmr.msra.gmra.mrb[2].mxu0 %vm603_vm2, %v2293_v11  ;;  %v857_v26 = vpop.permute.xlu1 %856 }
 0x15e   : > { %2002 = vmatprep.mubr.msk.f32.mxu0 %vm2157_vm0, %v2158_v6  ;;  %2001 = vmatpush3.msra.mxu0 %v510_v31 }
 0x15f   : > { %2010 = vmatprep.subr.mxu0 %v2158_v6 }
 0x230   : > { %v674_v15 = vpop.f32.mrb[2].mxu0 }
 0x231   : > { %v678_v17 = vmul.f32 0.35355338, %v674_v15  ;;  %v1994_v18 = vpop.f32.mrb[3].mxu0  ;;  %v1913_v15 = vld [vmem:[%s2485_s6] ss:$0 sm:$0xff] }
 0x233   : > { %v679_v19 = vadd.f32 %v678_v17, %v2309_v16 }
 0x235   : > { %v680_v20 = vsel %vm603_vm2, %v679_v19, -inf }
 0x236   : > { %681 = vmax.xlane.f32.xlu0 %v680_v20 }
 0x24c   : > { %945 = vrot.lane.b32.xlu0 %v2293_v11, %s2162_s26 }
 0x250   : > { %1101 = vrot.lane.b32.xlu0 %v2293_v11, %s2163_s27 }
 0x2c3   : > { %v682_v21 = vpop.xlane.xlu0 %681 }
 0x2c4   : > { %v683_v22 = vsub.f32 %v679_v19, %v682_v21  ;;  %v512_v21 = vld [vmem:[%s2484_s5 + $0x10] sm:$0xff] }
 0x2c6   : > { %v684_v23 = vmul.f32 1.442695, %v683_v22 }
 0x2c7   : > { %v946_v36 = vpop.permute.xlu0 %945 }
 0x2c8   : > { %2126 = vpow2.f32 %v684_v23 }
 0x2cb   : > { %v1102_v49 = vpop.permute.xlu0 %1101 }
 0x2d2   : > { %v2127_v24 = vpop.eup %2126 }
 0x2d3   : > { %v686_v25 = vsel %vm603_vm2, %v2127_v24, 0.0 }
 0x2d4   : > { %687 = vadd.xlane.f32.xlu1 %v686_v25 }
 0x2e5   : > { %854 = vrot.lane.b32.xlu1 %v2293_v11, %s2164_s29 }
 0x361   : > { %v688_v27 = vpop.xlane.xlu1 %687 }
 0x362   : > { %2128 = vrcp.f32 %v688_v27 }
 0x365   : > { %v855_v30 = vpop.permute.xlu1 %854 }
 0x36c   : > { %v2129_v28 = vpop.eup %2128 }
 0x36d   : > { %v690_v29 = vmul.f32 %v2129_v28, %v2127_v24 }
 0x36f   : > { %1998 = vmatmul.mubr.msk.f32.vlgmr.msra.gmra.mrb[0].mxu1 %vm603_vm2, %v690_v29 }
 0x370   : > { %2006 = vmatpush3.xpose.msk.msra.mxu1 %vm603_vm2, %v857_v26  ;;  %2007 = vmatprep.mubr.msk.f32.mxu1 %vm2157_vm0, %v2158_v6 }
 0x371   : > { %2015 = vmatprep.subr.mxu1 %v2158_v6 }
 0x373   : > { %2008 = vmatmul.mubr.msk.f32.vlgmr.msra.gmra.mrb[2].mxu1 %vm603_vm2, %v855_v30 }
 0x374   : > { %2017 = vmatprep.mubr.msk.f32.mxu1 %vm2157_vm0, %v2158_v6  ;;  %2016 = vmatpush3.msra.mxu1 %v511_v61 }
 0x375   : > { %2025 = vmatprep.subr.mxu1 %v2158_v6 }
 0x442   : > { %v763_v33 = vpop.f32.mrb[0].mxu1 }
 0x443   : > { %v773_v34 = vmul.f32 %v2333_v32, %v763_v33  ;;  %v1999_v35 = vpop.f32.mrb[1].mxu1 }
 0x445   : > { %2003 = vmatmul.mubr.msk.f32.vlgmr.msra.gmra.mrb[4].mxu0 %vm603_vm2, %v773_v34 }
 0x446   : > { %2011 = vmatpush3.msra.mxu0 %v946_v36  ;;  %v928_v37 = vpop.f32.mrb[2].mxu1  ;;  %2012 = vmatprep.mubr.msk.f32.mxu0 %vm2157_vm0, %v2158_v6 }
 0x447   : > { %v932_v38 = vmul.f32 0.35355338, %v928_v37  ;;  %v2009_v39 = vpop.f32.mrb[3].mxu1  ;;  %2020 = vmatprep.subr.mxu0 %v2158_v6 }
 0x449   : > { %v933_v40 = vadd.f32 %v932_v38, %v2309_v16 }
 0x44b   : > { %v934_v41 = vsel %vm603_vm2, %v933_v40, -inf }
 0x44c   : > { %935 = vmax.xlane.f32.xlu1 %v934_v41 }
 0x4d9   : > { %v936_v42 = vpop.xlane.xlu1 %935 }
 0x4da   : > { %v937_v43 = vsub.f32 %v933_v40, %v936_v42 }
 0x4dc   : > { %v938_v44 = vmul.f32 1.442695, %v937_v43 }
 0x4de   : > { %2130 = vpow2.f32 %v938_v44 }
 0x4e8   : > { %v2131_v45 = vpop.eup %2130 }
 0x4e9   : > { %v940_v46 = vsel %vm603_vm2, %v2131_v45, 0.0 }
 0x4ea   : > { %941 = vadd.xlane.f32.xlu0 %v940_v46 }
 0x500   : > { %1099 = vrot.lane.b32.xlu0 %v2293_v11, %s2165_s20 }
 0x518   : > { %v843_v47 = vpop.f32.mrb[4].mxu0 }
 0x519   : > { %v2004_v48 = vpop.f32.mrb[5].mxu0  ;;  %v853_v17 = vadd.f32 %v1913_v15, %v843_v47  ;;  %v1717_v15 = vld [vmem:[%s2490_s11 + $0x20] sm:$0xff] }
 0x577   : > { %v942_v50 = vpop.xlane.xlu0 %941 }
 0x578   : > { %2132 = vrcp.f32 %v942_v50 }
 0x57b   : > { %v1100_v53 = vpop.permute.xlu0 %1099 }
 0x582   : > { %v2133_v51 = vpop.eup %2132 }
 0x583   : > { %v944_v52 = vmul.f32 %v2133_v51, %v2131_v45 }
 0x585   : > { %2013 = vmatmul.mubr.msk.f32.vlgmr.msra.gmra.mrb[6].mxu0 %vm603_vm2, %v944_v52 }
 0x586   : > { %2021 = vmatpush3.xpose.msk.msra.mxu0 %vm603_vm2, %v1102_v49  ;;  %2022 = vmatprep.mubr.msk.f32.mxu0 %vm2157_vm0, %v2158_v6 }
 0x587   : > { %2030 = vmatprep.subr.mxu0 %v2158_v6 }
 0x589   : > { %2023 = vmatmul.mubr.msk.f32.vlgmr.msra.gmra.mrb[8].mxu0 %vm603_vm2, %v1100_v53 }
 0x58a   : > { %2032 = vmatprep.mubr.msk.f32.mxu0 %vm2157_vm0, %v2158_v6  ;;  %2031 = vmatpush3.msra.mxu0 %v512_v21 }
 0x58b   : > { %2040 = vmatprep.subr.mxu0 %v2158_v6 }
 0x658   : > { %v1017_v54 = vpop.f32.mrb[6].mxu0 }
 0x659   : > { %v2014_v55 = vpop.f32.mrb[7].mxu0 }
 0x65c   : > { %v1173_v56 = vpop.f32.mrb[8].mxu0 }
 0x65d   : > { %v1177_v57 = vmul.f32 0.35355338, %v1173_v56  ;;  %v2024_v58 = vpop.f32.mrb[9].mxu0  ;;  %v1620_v56 = vld [vmem:[%s2488_s9] sm:$0xff] }
 0x65e   : > { %v1623_v58 = vld [vmem:[%s2488_s9 + $0x18] sm:$0xff] }
 0x65f   : > { %v1178_v59 = vadd.f32 %v1177_v57, %v2309_v16 }
 0x661   : > { %v1179_v60 = vsel %vm603_vm2, %v1178_v59, -inf }
 0x662   : > { %1180 = vmax.xlane.f32.xlu1 %v1179_v60 }
 0x673   : > { %1021 = vrot.lane.b32.xlu1 %v2333_v32, %s2164_s29 }
 0x677   : > { %1190 = vrot.lane.b32.xlu1 %v2293_v11, %s2166_s23 }
 0x67b   : > { %1346 = vrot.lane.b32.xlu1 %v2293_v11, %s2167_s24 }
 0x67f   : > { %1344 = vrot.lane.b32.xlu1 %v2293_v11, %s2168_s25 }
 0x6ef   : > { %v1181_v62 = vpop.xlane.xlu1 %1180 }
 0x6f0   : > { %v1182_v63 = vsub.f32 %v1178_v59, %v1181_v62 }
 0x6f2   : > { %v1183_v0 = vmul.f32 1.442695, %v1182_v63 }
 0x6f3   : > { %v1022_v1 = vpop.permute.xlu1 %1021 }
 0x6f4   : > { %2134 = vpow2.f32 %v1183_v0  ;;  %v1024_v2 = vmul.f32 %v1022_v1, %v1017_v54  ;;  %v1926_v0 = vld [vmem:[%s2486_s7] ss:$0 sm:$0xff] }
 0x6f6   : > { %2018 = vmatmul.mubr.msk.f32.vlgmr.msra.gmra.mrb[4].mxu1 %vm603_vm2, %v1024_v2  ;;  %v1927_v2 = vld [vmem:[%s2487_s8] ss:$0 sm:$0xff] }
 0x6f7   : > { %v1191_v4 = vpop.permute.xlu1 %1190  ;;  %2027 = vmatprep.mubr.msk.f32.mxu1 %vm2157_vm0, %v2158_v6 }
 0x6f8   : > { %2026 = vmatpush3.msra.mxu1 %v1191_v4 }
 0x6f9   : > { %2035 = vmatprep.subr.mxu1 %v2158_v6 }
 0x6fb   : > { %v1347_v12 = vpop.permute.xlu1 %1346 }
 0x6fe   : > { %v2135_v5 = vpop.eup %2134 }
 0x6ff   : > { %v1185_v7 = vsel %vm603_vm2, %v2135_v5, 0.0  ;;  %v1345_v14 = vpop.permute.xlu1 %1344 }
 0x700   : > { %1186 = vadd.xlane.f32.xlu0 %v1185_v7  ;;  %v1713_v7 = vld [vmem:[%s2490_s11] sm:$0xff] }
 0x716   : > { %1266 = vrot.lane.b32.xlu0 %v2333_v32, %s2165_s20 }
 0x78d   : > { %v1187_v9 = vpop.xlane.xlu0 %1186 }
 0x78e   : > { %2136 = vrcp.f32 %v1187_v9  ;;  %v1714_v9 = vld [vmem:[%s2490_s11 + $0x8] sm:$0xff] }
 0x791   : > { %v1267_v22 = vpop.permute.xlu0 %1266 }
 0x798   : > { %v2137_v10 = vpop.eup %2136 }
 0x799   : > { %v1189_v13 = vmul.f32 %v2137_v10, %v2135_v5  ;;  %v2093_v10 = vpack.c.bf16 %v1714_v9, %v1713_v7 }
 0x79b   : > { %2028 = vmatmul.mubr.msk.f32.vlgmr.msra.gmra.mrb[6].mxu1 %vm603_vm2, %v1189_v13  ;;  %v1716_v13 = vld [vmem:[%s2490_s11 + $0x18] sm:$0xff] }
 0x79c   : > { %2036 = vmatpush3.xpose.msk.msra.mxu1 %vm603_vm2, %v1347_v12  ;;  %2037 = vmatprep.mubr.msk.f32.mxu1 %vm2157_vm0, %v2158_v6  ;;  %v1715_v12 = vld [vmem:[%s2490_s11 + $0x10] sm:$0xff] }
 0x79d   : > { %2045 = vmatprep.subr.mxu1 %v2158_v6 }
 0x79f   : > { %2038 = vmatmul.mubr.msk.f32.vlgmr.msra.gmra.mrb[8].mxu1 %vm603_vm2, %v1345_v14  ;;  %v2096_v14 = vpack.c.bf16 %v1716_v13, %v1715_v12 }
 0x7a0   : > { %2047 = vmatprep.mubr.msk.f32.mxu1 %vm2157_vm0, %v2158_v6 }
 0x7c9   : > { %v1094_v18 = vpop.f32.mrb[4].mxu1 }
 0x7ca   : > { %v1098_v19 = vadd.f32 %v1094_v18, %v853_v17  ;;  %v2019_v20 = vpop.f32.mrb[5].mxu1  ;;  %v1718_v17 = vld [vmem:[%s2490_s11 + $0x28] sm:$0xff] }
 0x7cb   : > { %v2099_v18 = vpack.c.bf16 %v1718_v17, %v1717_v15  ;;  %v1720_v20 = vld [vmem:[%s2490_s11 + $0x38] sm:$0xff] }
 0x86e   : > { %v1262_v23 = vpop.f32.mrb[6].mxu1 }
 0x86f   : > { %v1269_v24 = vmul.f32 %v1267_v22, %v1262_v23  ;;  %v2029_v25 = vpop.f32.mrb[7].mxu1  ;;  %v1928_v22 = vld [vmem:[%s2489_s10] ss:$0 sm:$0xff] }
 0x871   : > { %2033 = vmatmul.mubr.msk.f32.vlgmr.msra.gmra.mrb[10].mxu0 %vm603_vm2, %v1269_v24 }
 0x872   : > { %v1418_v26 = vpop.f32.mrb[8].mxu1  ;;  %2042 = vmatprep.mubr.msk.f32.mxu0 %vm2157_vm0, %v2158_v6 }
 0x873   : > { %v1422_v27 = vmul.f32 0.35355338, %v1418_v26  ;;  %v2039_v28 = vpop.f32.mrb[9].mxu1 }
 0x875   : > { %v1423_v29 = vadd.f32 %v1422_v27, %v2309_v16  ;;  %v513_v16 = vld [vmem:[%s2484_s5 + $0x18] sm:$0xff] }
 0x876   : > { %2046 = vmatpush3.msra.mxu1 %v513_v16 }
 0x877   : > { %v1424_v30 = vsel %vm603_vm2, %v1423_v29, -inf  ;;  %2092 = vmatprep.subr.bf16.mxu1 %v2156_v3 }
 0x878   : > { %1425 = vmax.xlane.f32.xlu1 %v1424_v30 }
 0x905   : > { %v1426_v31 = vpop.xlane.xlu1 %1425 }
 0x906   : > { %v1427_v33 = vsub.f32 %v1423_v29, %v1426_v31 }
 0x908   : > { %v1428_v34 = vmul.f32 1.442695, %v1427_v33 }
 0x90a   : > { %2138 = vpow2.f32 %v1428_v34 }
 0x914   : > { %v2139_v35 = vpop.eup %2138 }
 0x915   : > { %v1430_v36 = vsel %vm603_vm2, %v2139_v35, 0.0 }
 0x916   : > { %1431 = vadd.xlane.f32.xlu0 %v1430_v36 }
 0x92c   : > { %1435 = vrot.lane.b32.xlu0 %v2293_v11, %s2169_s16 }
 0x930   : > { %1511 = vrot.lane.b32.xlu0 %v2333_v32, %s2168_s25 }
 0x944   : > { %v1339_v37 = vpop.f32.mrb[10].mxu0 }
 0x945   : > { %v1343_v38 = vadd.f32 %v1339_v37, %v1098_v19  ;;  %v2034_v39 = vpop.f32.mrb[11].mxu0  ;;  %v1719_v19 = vld [vmem:[%s2490_s11 + $0x30] sm:$0xff] }
 0x946   : > { %v2102_v21 = vpack.c.bf16 %v1720_v20, %v1719_v19 }
 0x9a3   : > { %v1432_v40 = vpop.xlane.xlu0 %1431 }
 0x9a4   : > { %2140 = vrcp.f32 %v1432_v40 }
 0x9a7   : > { %v1436_v41 = vpop.permute.xlu0 %1435 }
 0x9a8   : > { %2041 = vmatpush3.msra.mxu0 %v1436_v41 }
 0x9a9   : > { %2086 = vmatprep.subr.bf16.mxu0 %v2156_v3 }
 0x9ab   : > { %v1512_v32 = vpop.permute.xlu0 %1511 }
 0x9ae   : > { %v2141_v11 = vpop.eup %2140 }
 0x9af   : > { %v1434_v42 = vmul.f32 %v2141_v11, %v2139_v35 }
 0x9b1   : > { %2043 = vmatmul.mubr.msk.f32.vlgmr.msra.gmra.mrb[12].mxu0 %vm603_vm2, %v1434_v42 }
 0x9b2   : > { %2058 = vmatprep.mubr.msk.f32.mxu0 %vm2157_vm0, %v2158_v6 }
 0xa84   : > { %v1507_v43 = vpop.f32.mrb[12].mxu0 }
 0xa85   : > { %v1514_v44 = vmul.f32 %v1512_v32, %v1507_v43  ;;  %v2044_v45 = vpop.f32.mrb[13].mxu0 }
 0xa87   : > { %2048 = vmatmul.mubr.msk.f32.vlgmr.msra.gmra.mrb[10].mxu1 %vm603_vm2, %v1514_v44 }
 0xa88   : > { %2077 = vmatprep.mubr.msk.f32.mxu1 %vm2157_vm0, %v2158_v6  ;;  %v1621_v6 = vld [vmem:[%s2488_s9 + $0x8] sm:$0xff]  ;;  %2094 = vmatpush3.bf16.msra.mxu1 %v2093_v10 }
 0xa89   : > { %v2087_v57 = vpack.c.bf16 %v1621_v6, %v1620_v56  ;;  %2095 = vmatprep.subr.bf16.mxu1 %v2156_v3 }
 0xa8b   : > { %2088 = vmatpush3.bf16.msra.mxu0 %v2087_v57 }
 0xa8c   : > { %2089 = vmatprep.subr.bf16.mxu0 %v2156_v3  ;;  %2097 = vmatpush3.bf16.msra.mxu1 %v2096_v14 }
 0xa8d   : > { %2098 = vmatprep.subr.bf16.mxu1 %v2156_v3 }
 0xa90   : > { %2100 = vmatpush3.bf16.msra.mxu1 %v2099_v18 }
 0xa91   : > { %2101 = vmatprep.subr.bf16.mxu1 %v2156_v3  ;;  %v1930_v3 = vld [vmem:[%s2491_s12] ss:$0 sm:$0xff] }
 0xa94   : > { %2103 = vmatpush3.bf16.msra.mxu1 %v2102_v21 }
 0xb5a   : > { %v1584_v46 = vpop.f32.mrb[10].mxu1 }
 0xb5b   : > { %v1588_v47 = vadd.f32 %v1584_v46, %v1343_v38  ;;  %v2049_v48 = vpop.f32.mrb[11].mxu1 }
 0xb5d   : > { %v1589_v49 = vadd.f32 %v1588_v47, %v2283_v8  ;;  %v1622_v8 = vld [vmem:[%s2488_s9 + $0x10] sm:$0xff]  ;;  %v1932_v47 = vld [vmem:[%s2492_s13] ss:$0 sm:$0xff] }
 0xb5e   : > { %v2090_v59 = vpack.c.bf16 %v1623_v58, %v1622_v8 }
 0xb5f   : > { %v1592_v50 = vsel %vm525_vm1, %v1589_v49, 0.0 }
 0xb60   : > { %1593 = vadd.xlane.f32.xlu0 %v1592_v50  ;;  %2091 = vmatpush3.bf16.msra.mxu0 %v2090_v59 }
 0xbed   : > { %v1594_v51 = vpop.xlane.xlu0 %1593 }
 0xbee   : > { %v1596_v52 = vmul.f32 0.03125, %v1594_v51 }
 0xbf0   : > { %v1597_v53 = vsub.f32 %v1589_v49, %v1596_v52  ;;  %v1933_v49 = vld [vmem:[%s2493_s14] ss:$0 sm:$0xff] }
 0xbf2   : > { %v1598_v54 = vmul.f32 %v1597_v53, %v1597_v53 }
 0xbf4   : > { %v1599_v55 = vsel %vm525_vm1, %v1598_v54, 0.0 }
 0xbf5   : > { %1600 = vadd.xlane.f32.xlu1 %v1599_v55 }
 0xc82   : > { %v1601_v60 = vpop.xlane.xlu1 %1600 }
 0xc83   : > { %v1602_v61 = vmul.f32 0.03125, %v1601_v60 }
 0xc85   : > { %v1603_v62 = vadd.f32 1e-12, %v1602_v61 }
 0xc87   : > { %2142 = vrsqrt.f32 %v1603_v62 }
 0xc91   : > { %v2143_v63 = vpop.eup %2142 }
 0xc92   : > { %v1605_v1 = vmul.f32 %v2143_v63, %v1597_v53 }
 0xc94   : > { %v1612_v4 = vmul.f32 %v1926_v0, %v1605_v1 }
 0xc96   : > { %v1619_v5 = vadd.f32 %v1927_v2, %v1612_v4 }
 0xc98   : > { %2059 = vmatmul.mubr.msk.f32.vlgmr.msra.gmra.mrb[14].mxu0 %vm525_vm1, %v1619_v5 }
 0xd6b   : > { %v1700_v23 = vpop.f32.mrb[14].mxu0 }
 0xd6c   : > { %v1701_v24 = vadd.f32 %v1928_v22, %v1700_v23  ;;  %v2060_v25 = vpop.f32.mrb[15].mxu0 }
 0xd6e   : > { %v1705_v26 = vmul.f32 0.044715, %v1701_v24  ;;  %v1704_v33 = vmul.f32 0.5, %v1701_v24 }
 0xd70   : > { %v1706_v27 = vmul.f32 %v1705_v26, %v1701_v24 }
 0xd72   : > { %v1707_v28 = vmul.f32 %v1706_v27, %v1701_v24 }
 0xd74   : > { %v1708_v29 = vadd.f32 %v1707_v28, %v1701_v24 }
 0xd76   : > { %v1709_v30 = vmul.f32 0.7978846, %v1708_v29 }
 0xd78   : > { %2144 = vtanh.f32 %v1709_v30 }
 0xd82   : > { %v2145_v31 = vpop.eup %2144 }
 0xd83   : > { %v1711_v34 = vadd.f32 1.0, %v2145_v31 }
 0xd85   : > { %v1712_v35 = vmul.f32 %v1711_v34, %v1704_v33 }
 0xd87   : > { %2078 = vmatmul.mubr.msk.f32.vlgmr.msra.gmra.mrb[12].mxu1 %vm1728_vm3, %v1712_v35 }
 0xe5a   : > { %v1798_v36 = vpop.f32.mrb[12].mxu1 }
 0xe5b   : > { %v1799_v16 = vadd.f32 %v1930_v3, %v1798_v36  ;;  %v2079_v37 = vpop.f32.mrb[13].mxu1 }
 0xe5d   : > { %v1802_v38 = vadd.f32 %v1799_v16, %v1619_v5 }
 0xe5f   : > { %v1805_v39 = vsel %vm525_vm1, %v1802_v38, 0.0 }
 0xe60   : > { %1806 = vadd.xlane.f32.xlu1 %v1805_v39 }
 0xeed   : > { %v1807_v40 = vpop.xlane.xlu1 %1806 }
 0xeee   : > { %v1808_v41 = vmul.f32 0.03125, %v1807_v40 }
 0xef0   : > { %v1809_v11 = vsub.f32 %v1802_v38, %v1808_v41 }
 0xef2   : > { %v1810_v42 = vmul.f32 %v1809_v11, %v1809_v11 }
 0xef4   : > { %v1811_v32 = vsel %vm525_vm1, %v1810_v42, 0.0 }
 0xef5   : > { %1812 = vadd.xlane.f32.xlu1 %v1811_v32 }
 0xf82   : > { %v1813_v43 = vpop.xlane.xlu1 %1812 }
 0xf83   : > { %v1814_v44 = vmul.f32 0.03125, %v1813_v43 }
 0xf85   : > { %v1815_v45 = vadd.f32 1e-12, %v1814_v44 }
 0xf87   : > { %2146 = vrsqrt.f32 %v1815_v45 }
 0xf91   : > { %v2147_v46 = vpop.eup %2146 }
 0xf92   : > { %v1817_v48 = vmul.f32 %v2147_v46, %v1809_v11 }
 0xf94   : > { %v1824_v50 = vmul.f32 %v1932_v47, %v1817_v48 }
 0xf96   : > { %v1831_v51 = vadd.f32 %v1933_v49, %v1824_v50 }
 0xf98   : > { %1832 = vst.msk [vmem:[%s506_s19] sm:$0xff] %vm525_vm1, %v1831_v51 }
 0xf99 PF: > { %s25_s18 = sadd.s32 1, %s2154_s18  }
 0xf9a   : > { %p22_p4 = scmp.ge.s32.totalorder %s25_s18, 6  }
 0xf9c   :  { %24 = sbr.rel (!%p22_p4) target bundleno = 1 (0x1), region = 113 }

</bundles_post_ra>
